<compile_context>
chip_gen: v6e
topology: v6e:2x2x1
jax: 0.10.0
libtpu: 0.0.40
codegen_flags: <defaults>
</compile_context>

<pallas_src>
import jax
import jax.numpy as jnp
from jax import lax
from jax.experimental import pallas as pl
from jax.experimental.pallas import tpu as pltpu


def _rnn_classify_kernel(tok_ref,      # ((L-1)*B, 1) int32  time-major flat token ids (row = t*B + b)
                         embproj_ref,  # (Vp, H)  bf16   emb @ W_ih_l0 + b1, zero-padded rows to Vp=128
                         whh1_ref,     # (H, H)   bf16   layer-1 recurrent weights (pre-transposed)
                         wih2_ref,     # (H, H)   bf16   layer-2 input weights   (pre-transposed)
                         whh2_ref,     # (H, H)   bf16   layer-2 recurrent weights (pre-transposed)
                         b2_ref,       # (1, H)   f32    b_ih_l1 + b_hh_l1
                         wcls_ref,     # (H, Op)  bf16   classifier weights (pre-transposed, lane-padded)
                         bcls_ref,     # (1, Op)  f32    classifier bias (lane-padded)
                         out_ref,      # (B, Op)  f32    logits (lane-padded)
                         xproj_ref):   # ((L-1)*B, H) f32 VMEM scratch
    LB = tok_ref.shape[0]
    Vp = embproj_ref.shape[0]
    H = whh1_ref.shape[1]
    B = out_ref.shape[0]
    T = LB // B                                   # = L - 1 recurrence steps

    # --- Prologue: fused embedding gather + layer-1 input projection (+ folded b1).
    # One off-critical-path (LB, 128) @ (128, H) bf16 matmul; exact row selection
    # since one-hot entries are 0/1 and accumulation is f32.
    onehot = (tok_ref[...] == lax.broadcasted_iota(jnp.int32, (LB, Vp), 1)
              ).astype(jnp.bfloat16)              # (LB, Vp) full 128-lane vregs
    xproj_ref[...] = jnp.dot(onehot, embproj_ref[...],
                             preferred_element_type=jnp.float32)

    h1 = jnp.zeros((B, H), jnp.bfloat16)
    h2 = jnp.zeros((B, H), jnp.bfloat16)

    def step(t, carry):
        h1, h2 = carry                            # both bf16
        xp = xproj_ref[pl.ds(pl.multiple_of(t * B, B), B), :]          # (B, H) f32
        # Independent of this step's h1 -> overlaps with the layer-1 chain.
        p2h = jnp.dot(h2, whh2_ref[...], preferred_element_type=jnp.float32)
        # Layer 1 (serial chain): one K=128 bf16 matmul + f32 add + f32 tanh.
        h1 = jnp.tanh(xp + jnp.dot(h1, whh1_ref[...],
                                   preferred_element_type=jnp.float32)
                      ).astype(jnp.bfloat16)
        # Layer 2: one K=128 matmul after h1 is ready; (1,H) bias row adds via
        # sublane broadcast (not pre-broadcast to (B,H)).
        h2 = jnp.tanh(jnp.dot(h1, wih2_ref[...],
                              preferred_element_type=jnp.float32)
                      + p2h + b2_ref[...]
                      ).astype(jnp.bfloat16)
        return h1, h2

    # x[:, -2, :] == layer-2 hidden state after timestep L-2, i.e. L-1 steps.
    _, h2 = lax.fori_loop(0, T, step, (h1, h2), unroll=True)

    out_ref[...] = (jnp.dot(h2, wcls_ref[...], preferred_element_type=jnp.float32)
                    + bcls_ref[...])


def rnn_classify(tokens, kparams):
    """tokens: (B, L) int32 token ids.  kparams: output of prepare_kernel_params."""
    B, L = tokens.shape
    Vp, H = kparams["embproj"].shape
    Op = kparams["wcls"].shape[1]
    O = kparams["out_size"]

    # Only the first L-1 timesteps feed the recurrence (x[:, -2, :]).
    # Clip ids as a guard (PyTorch's Embedding would raise on out-of-range ids).
    tok = jnp.clip(tokens[:, :L - 1], 0, Vp - 1)
    tok_tm = tok.T.reshape((L - 1) * B, 1).astype(jnp.int32)   # tiny int32 layout op only

    args = (tok_tm, kparams["embproj"], kparams["whh1"], kparams["wih2"],
            kparams["whh2"], kparams["b2"], kparams["wcls"], kparams["bcls"])

    def full(shape):
        return pl.BlockSpec(shape, lambda *_: (0,) * len(shape))

    out_padded = pl.pallas_call(
        _rnn_classify_kernel,
        out_shape=jax.ShapeDtypeStruct((B, Op), jnp.float32),
        grid=(),
        in_specs=[full(a.shape) for a in args],
        out_specs=full((B, Op)),
        scratch_shapes=[pltpu.VMEM(((L - 1) * B, H), jnp.float32)],
    )(*args)
    return out_padded[:, :O]


def make_params(key, vocab_size, vector_dim, hidden, out_size):
    ks = jax.random.split(key, 10)
    scale = 0.1
    emb = scale * jax.random.normal(ks[0], (vocab_size, vector_dim), jnp.float32)
    emb = emb.at[0].set(0.0)  # padding_idx=0
    params = {
        # stored already transposed so matmuls are plain (B,K)@(K,N)
        "wih1": scale * jax.random.normal(ks[1], (vector_dim, hidden), jnp.float32),
        "whh1": scale * jax.random.normal(ks[2], (hidden, hidden), jnp.float32),
        "b1":   scale * jax.random.normal(ks[3], (1, hidden), jnp.float32),
        "wih2": scale * jax.random.normal(ks[4], (hidden, hidden), jnp.float32),
        "whh2": scale * jax.random.normal(ks[5], (hidden, hidden), jnp.float32),
        "b2":   scale * jax.random.normal(ks[6], (1, hidden), jnp.float32),
        "wcls": scale * jax.random.normal(ks[7], (hidden, out_size), jnp.float32),
        "bcls": scale * jax.random.normal(ks[8], (1, out_size), jnp.float32),
    }
    return emb, params


def prepare_kernel_params(emb, params, *, vocab_pad=128, out_pad=128):
    """One-time parameter preprocessing:
      - fold embedding table with W_ih_l0 AND b1 (exactly one one-hot entry is 1),
      - pad vocab rows to 128 (dense K for the one-hot matmul),
      - pad classifier lanes to 128 (lane-dense unmasked store),
      - cast all MXU operands to bf16."""
    V, _ = emb.shape
    H = params["whh1"].shape[0]
    O = params["wcls"].shape[1]

    embproj = emb @ params["wih1"] + params["b1"]                       # (V, H)
    # Padded rows behave like the padding token (zero embedding + b1).
    embproj_padded = jnp.broadcast_to(params["b1"], (vocab_pad, H)).astype(jnp.float32)
    embproj_padded = embproj_padded.at[:V].set(embproj)

    wcls_padded = jnp.zeros((H, out_pad), jnp.float32).at[:, :O].set(params["wcls"])
    bcls_padded = jnp.zeros((1, out_pad), jnp.float32).at[:, :O].set(params["bcls"])

    return {
        "embproj": embproj_padded.astype(jnp.bfloat16),   # (Vp, H)
        "whh1":    params["whh1"].astype(jnp.bfloat16),   # (H, H)
        "wih2":    params["wih2"].astype(jnp.bfloat16),   # (H, H)
        "whh2":    params["whh2"].astype(jnp.bfloat16),   # (H, H)
        "b2":      params["b2"].astype(jnp.float32),      # (1, H)
        "wcls":    wcls_padded.astype(jnp.bfloat16),      # (H, Op)
        "bcls":    bcls_padded,                           # (1, Op) f32
        "out_size": O,
    }


def reference_forward(tokens, emb, params):
    """Pure-JAX f32 reference mirroring the PyTorch forward (inference)."""
    x = emb[tokens]                                        # (B, L, D)
    B, L, _ = x.shape
    H = params["whh1"].shape[0]
    h1 = jnp.zeros((B, H), jnp.float32)
    h2 = jnp.zeros((B, H), jnp.float32)
    outs = []
    for t in range(L):
        h1 = jnp.tanh(x[:, t, :] @ params["wih1"] + h1 @ params["whh1"] + params["b1"])
        h2 = jnp.tanh(h1 @ params["wih2"] + h2 @ params["whh2"] + params["b2"])
        outs.append(h2)
    feat = outs[-2]                                        # x[:, -2, :]
    return feat @ params["wcls"] + params["bcls"]


def reference_forward_bf16(tokens, kp):
    """Mirrors the kernel's exact arithmetic (bf16 MXU operands, f32 acc, bf16 state)."""
    B, L = tokens.shape
    H = kp["whh1"].shape[1]
    O = kp["out_size"]
    xproj = kp["embproj"][tokens].astype(jnp.float32)      # (B, L, H) (b1 folded in)
    h1 = jnp.zeros((B, H), jnp.bfloat16)
    h2 = jnp.zeros((B, H), jnp.bfloat16)
    for t in range(L - 1):
        p2h = jnp.dot(h2, kp["whh2"], preferred_element_type=jnp.float32)
        h1 = jnp.tanh(xproj[:, t, :]
                      + jnp.dot(h1, kp["whh1"], preferred_element_type=jnp.float32)
                      ).astype(jnp.bfloat16)
        h2 = jnp.tanh(jnp.dot(h1, kp["wih2"], preferred_element_type=jnp.float32)
                      + p2h + kp["b2"]).astype(jnp.bfloat16)
    out = (jnp.dot(h2, kp["wcls"], preferred_element_type=jnp.float32) + kp["bcls"])
    return out[:, :O]


if __name__ == "__main__":
    # Small shapes consistent with the module (hidden=128 is fixed by nn.RNN).
    vocab_size = 32    # len(vocab)
    vector_dim = 32
    sen_len = 8
    out_size = 8
    hidden = 128
    batch = 64         # multiple of 8 -> good MXU row utilization

    key = jax.random.PRNGKey(0)
    k_tok, k_par = jax.random.split(key)
    emb, params = make_params(k_par, vocab_size, vector_dim, hidden, out_size)
    tokens = jax.random.randint(k_tok, (batch, sen_len), 0, vocab_size, jnp.int32)

    kparams = prepare_kernel_params(emb, params)

    logits = rnn_classify(tokens, kparams)
    logits = jax.block_until_ready(logits)
    assert logits.shape == (batch, out_size)

    # Tight check against a reference mimicking the kernel's bf16/f32 arithmetic.
    ref_exact = reference_forward_bf16(tokens, kparams)
    assert jnp.allclose(logits, ref_exact, atol=5e-3, rtol=5e-3), \
        "mismatch vs bf16-exact reference"

    # Loose check against the pure-f32 PyTorch-equivalent reference (bf16 drift).
    ref_f32 = reference_forward(tokens, emb, params)
    assert jnp.allclose(logits, ref_f32, atol=1e-1, rtol=1e-1), \
        "bf16 drift vs f32 reference too large"

    # TODO(synk): CrossEntropyLoss branch (y is not None) not fused into the kernel;
    # inference path (y_pred) is what is implemented here.
    print("KERNEL_OK")
</pallas_src>

<mosaic_0001>
module attributes {stable_mosaic.version = 11 : i64} {
  func.func @_rnn_classify_kernel(%arg0: memref<448x1xi32, #tpu.memory_space<vmem>>, %arg1: memref<128x128xbf16, #tpu.memory_space<vmem>>, %arg2: memref<128x128xbf16, #tpu.memory_space<vmem>>, %arg3: memref<128x128xbf16, #tpu.memory_space<vmem>>, %arg4: memref<128x128xbf16, #tpu.memory_space<vmem>>, %arg5: memref<1x128xf32, #tpu.memory_space<vmem>>, %arg6: memref<128x128xbf16, #tpu.memory_space<vmem>>, %arg7: memref<1x128xf32, #tpu.memory_space<vmem>>, %arg8: memref<64x128xf32, #tpu.memory_space<vmem>>, %arg9: memref<448x128xf32, #tpu.memory_space<vmem>>) attributes {dimension_semantics = [], scalar_prefetch = 0 : i64, scratch_operands = 1 : i64, tpu.core_type = #tpu.core_type<tc>} {
    %c0 = arith.constant 0 : index
    %c0_0 = arith.constant 0 : index
    %0 = vector.load %arg0[%c0, %c0_0] : memref<448x1xi32, #tpu.memory_space<vmem>>, vector<448x1xi32>
    %1 = tpu.iota {dimensions = array<i32: 1>} : vector<448x128xi32>
    %2 = vector.broadcast %0 : vector<448x1xi32> to vector<448x128xi32>
    %3 = arith.cmpi eq, %2, %1 : vector<448x128xi32>
    %4 = arith.extui %3 : vector<448x128xi1> to vector<448x128xi32>
    %5 = arith.sitofp %4 : vector<448x128xi32> to vector<448x128xf32>
    %6 = arith.truncf %5 : vector<448x128xf32> to vector<448x128xbf16>
    %c0_1 = arith.constant 0 : index
    %c0_2 = arith.constant 0 : index
    %7 = vector.load %arg1[%c0_1, %c0_2] : memref<128x128xbf16, #tpu.memory_space<vmem>>, vector<128x128xbf16>
    %cst = arith.constant dense<0.000000e+00> : vector<448x128xf32>
    %8 = tpu.matmul %6, %7, %cst {dimension_numbers = #tpu.dot_dimension_numbers<[1], [0], [0], [1], [0, 0, 1, 1], [], []>} : vector<448x128xbf16>, vector<128x128xbf16>, vector<448x128xf32> -> vector<448x128xf32>
    %c0_3 = arith.constant 0 : index
    %c0_4 = arith.constant 0 : index
    %9 = vector.load %arg9[%c0_3, %c0_4] : memref<448x128xf32, #tpu.memory_space<vmem>>, vector<448x128xf32>
    tpu.vector_store %arg9[%c0_3, %c0_4], %8 {strides = array<i32>} : memref<448x128xf32, #tpu.memory_space<vmem>>, vector<448x128xf32>,
    %cst_5 = arith.constant 0.000000e+00 : bf16
    %10 = vector.broadcast %cst_5 : bf16 to vector<64x128xbf16>
    %cst_6 = arith.constant 0.000000e+00 : bf16
    %11 = vector.broadcast %cst_6 : bf16 to vector<64x128xbf16>
    %c0_i32 = arith.constant 0 : i32
    %c64_i32 = arith.constant 64 : i32
    %12 = arith.muli %c0_i32, %c64_i32 : i32
    %13 = tpu.assume_multiple %12, 64 : i32
    %14 = arith.index_cast %13 : i32 to index
    %c0_7 = arith.constant 0 : index
    %15 = vector.load %arg9[%14, %c0_7] : memref<448x128xf32, #tpu.memory_space<vmem>>, vector<64x128xf32>
    %c0_8 = arith.constant 0 : index
    %c0_9 = arith.constant 0 : index
    %16 = vector.load %arg4[%c0_8, %c0_9] : memref<128x128xbf16, #tpu.memory_space<vmem>>, vector<128x128xbf16>
    %cst_10 = arith.constant dense<0.000000e+00> : vector<64x128xf32>
    %17 = tpu.matmul %11, %16, %cst_10 {dimension_numbers = #tpu.dot_dimension_numbers<[1], [0], [0], [1], [0, 0, 1, 1], [], []>} : vector<64x128xbf16>, vector<128x128xbf16>, vector<64x128xf32> -> vector<64x128xf32>
    %c0_11 = arith.constant 0 : index
    %c0_12 = arith.constant 0 : index
    %18 = vector.load %arg2[%c0_11, %c0_12] : memref<128x128xbf16, #tpu.memory_space<vmem>>, vector<128x128xbf16>
    %cst_13 = arith.constant dense<0.000000e+00> : vector<64x128xf32>
    %19 = tpu.matmul %10, %18, %cst_13 {dimension_numbers = #tpu.dot_dimension_numbers<[1], [0], [0], [1], [0, 0, 1, 1], [], []>} : vector<64x128xbf16>, vector<128x128xbf16>, vector<64x128xf32> -> vector<64x128xf32>
    %20 = arith.addf %15, %19 : vector<64x128xf32>
    %21 = math.tanh %20 : vector<64x128xf32>
    %22 = arith.truncf %21 : vector<64x128xf32> to vector<64x128xbf16>
    %c0_14 = arith.constant 0 : index
    %c0_15 = arith.constant 0 : index
    %23 = vector.load %arg3[%c0_14, %c0_15] : memref<128x128xbf16, #tpu.memory_space<vmem>>, vector<128x128xbf16>
    %cst_16 = arith.constant dense<0.000000e+00> : vector<64x128xf32>
    %24 = tpu.matmul %22, %23, %cst_16 {dimension_numbers = #tpu.dot_dimension_numbers<[1], [0], [0], [1], [0, 0, 1, 1], [], []>} : vector<64x128xbf16>, vector<128x128xbf16>, vector<64x128xf32> -> vector<64x128xf32>
    %25 = arith.addf %24, %17 : vector<64x128xf32>
    %c0_17 = arith.constant 0 : index
    %c0_18 = arith.constant 0 : index
    %26 = vector.load %arg5[%c0_17, %c0_18] : memref<1x128xf32, #tpu.memory_space<vmem>>, vector<1x128xf32>
    %27 = vector.broadcast %26 : vector<1x128xf32> to vector<64x128xf32>
    %28 = arith.addf %25, %27 : vector<64x128xf32>
    %29 = math.tanh %28 : vector<64x128xf32>
    %30 = arith.truncf %29 : vector<64x128xf32> to vector<64x128xbf16>
    %c1_i32 = arith.constant 1 : i32
    %c64_i32_19 = arith.constant 64 : i32
    %31 = arith.muli %c1_i32, %c64_i32_19 : i32
    %32 = tpu.assume_multiple %31, 64 : i32
    %33 = arith.index_cast %32 : i32 to index
    %c0_20 = arith.constant 0 : index
    %34 = vector.load %arg9[%33, %c0_20] : memref<448x128xf32, #tpu.memory_space<vmem>>, vector<64x128xf32>
    %c0_21 = arith.constant 0 : index
    %c0_22 = arith.constant 0 : index
    %35 = vector.load %arg4[%c0_21, %c0_22] : memref<128x128xbf16, #tpu.memory_space<vmem>>, vector<128x128xbf16>
    %cst_23 = arith.constant dense<0.000000e+00> : vector<64x128xf32>
    %36 = tpu.matmul %30, %35, %cst_23 {dimension_numbers = #tpu.dot_dimension_numbers<[1], [0], [0], [1], [0, 0, 1, 1], [], []>} : vector<64x128xbf16>, vector<128x128xbf16>, vector<64x128xf32> -> vector<64x128xf32>
    %c0_24 = arith.constant 0 : index
    %c0_25 = arith.constant 0 : index
    %37 = vector.load %arg2[%c0_24, %c0_25] : memref<128x128xbf16, #tpu.memory_space<vmem>>, vector<128x128xbf16>
    %cst_26 = arith.constant dense<0.000000e+00> : vector<64x128xf32>
    %38 = tpu.matmul %22, %37, %cst_26 {dimension_numbers = #tpu.dot_dimension_numbers<[1], [0], [0], [1], [0, 0, 1, 1], [], []>} : vector<64x128xbf16>, vector<128x128xbf16>, vector<64x128xf32> -> vector<64x128xf32>
    %39 = arith.addf %34, %38 : vector<64x128xf32>
    %40 = math.tanh %39 : vector<64x128xf32>
    %41 = arith.truncf %40 : vector<64x128xf32> to vector<64x128xbf16>
    %c0_27 = arith.constant 0 : index
    %c0_28 = arith.constant 0 : index
    %42 = vector.load %arg3[%c0_27, %c0_28] : memref<128x128xbf16, #tpu.memory_space<vmem>>, vector<128x128xbf16>
    %cst_29 = arith.constant dense<0.000000e+00> : vector<64x128xf32>
    %43 = tpu.matmul %41, %42, %cst_29 {dimension_numbers = #tpu.dot_dimension_numbers<[1], [0], [0], [1], [0, 0, 1, 1], [], []>} : vector<64x128xbf16>, vector<128x128xbf16>, vector<64x128xf32> -> vector<64x128xf32>
    %44 = arith.addf %43, %36 : vector<64x128xf32>
    %c0_30 = arith.constant 0 : index
    %c0_31 = arith.constant 0 : index
    %45 = vector.load %arg5[%c0_30, %c0_31] : memref<1x128xf32, #tpu.memory_space<vmem>>, vector<1x128xf32>
    %46 = vector.broadcast %45 : vector<1x128xf32> to vector<64x128xf32>
    %47 = arith.addf %44, %46 : vector<64x128xf32>
    %48 = math.tanh %47 : vector<64x128xf32>
    %49 = arith.truncf %48 : vector<64x128xf32> to vector<64x128xbf16>
    %c2_i32 = arith.constant 2 : i32
    %c64_i32_32 = arith.constant 64 : i32
    %50 = arith.muli %c2_i32, %c64_i32_32 : i32
    %51 = tpu.assume_multiple %50, 64 : i32
    %52 = arith.index_cast %51 : i32 to index
    %c0_33 = arith.constant 0 : index
    %53 = vector.load %arg9[%52, %c0_33] : memref<448x128xf32, #tpu.memory_space<vmem>>, vector<64x128xf32>
    %c0_34 = arith.constant 0 : index
    %c0_35 = arith.constant 0 : index
    %54 = vector.load %arg4[%c0_34, %c0_35] : memref<128x128xbf16, #tpu.memory_space<vmem>>, vector<128x128xbf16>
    %cst_36 = arith.constant dense<0.000000e+00> : vector<64x128xf32>
    %55 = tpu.matmul %49, %54, %cst_36 {dimension_numbers = #tpu.dot_dimension_numbers<[1], [0], [0], [1], [0, 0, 1, 1], [], []>} : vector<64x128xbf16>, vector<128x128xbf16>, vector<64x128xf32> -> vector<64x128xf32>
    %c0_37 = arith.constant 0 : index
    %c0_38 = arith.constant 0 : index
    %56 = vector.load %arg2[%c0_37, %c0_38] : memref<128x128xbf16, #tpu.memory_space<vmem>>, vector<128x128xbf16>
    %cst_39 = arith.constant dense<0.000000e+00> : vector<64x128xf32>
    %57 = tpu.matmul %41, %56, %cst_39 {dimension_numbers = #tpu.dot_dimension_numbers<[1], [0], [0], [1], [0, 0, 1, 1], [], []>} : vector<64x128xbf16>, vector<128x128xbf16>, vector<64x128xf32> -> vector<64x128xf32>
    %58 = arith.addf %53, %57 : vector<64x128xf32>
    %59 = math.tanh %58 : vector<64x128xf32>
    %60 = arith.truncf %59 : vector<64x128xf32> to vector<64x128xbf16>
    %c0_40 = arith.constant 0 : index
    %c0_41 = arith.constant 0 : index
    %61 = vector.load %arg3[%c0_40, %c0_41] : memref<128x128xbf16, #tpu.memory_space<vmem>>, vector<128x128xbf16>
    %cst_42 = arith.constant dense<0.000000e+00> : vector<64x128xf32>
    %62 = tpu.matmul %60, %61, %cst_42 {dimension_numbers = #tpu.dot_dimension_numbers<[1], [0], [0], [1], [0, 0, 1, 1], [], []>} : vector<64x128xbf16>, vector<128x128xbf16>, vector<64x128xf32> -> vector<64x128xf32>
    %63 = arith.addf %62, %55 : vector<64x128xf32>
    %c0_43 = arith.constant 0 : index
    %c0_44 = arith.constant 0 : index
    %64 = vector.load %arg5[%c0_43, %c0_44] : memref<1x128xf32, #tpu.memory_space<vmem>>, vector<1x128xf32>
    %65 = vector.broadcast %64 : vector<1x128xf32> to vector<64x128xf32>
    %66 = arith.addf %63, %65 : vector<64x128xf32>
    %67 = math.tanh %66 : vector<64x128xf32>
    %68 = arith.truncf %67 : vector<64x128xf32> to vector<64x128xbf16>
    %c3_i32 = arith.constant 3 : i32
    %c64_i32_45 = arith.constant 64 : i32
    %69 = arith.muli %c3_i32, %c64_i32_45 : i32
    %70 = tpu.assume_multiple %69, 64 : i32
    %71 = arith.index_cast %70 : i32 to index
    %c0_46 = arith.constant 0 : index
    %72 = vector.load %arg9[%71, %c0_46] : memref<448x128xf32, #tpu.memory_space<vmem>>, vector<64x128xf32>
    %c0_47 = arith.constant 0 : index
    %c0_48 = arith.constant 0 : index
    %73 = vector.load %arg4[%c0_47, %c0_48] : memref<128x128xbf16, #tpu.memory_space<vmem>>, vector<128x128xbf16>
    %cst_49 = arith.constant dense<0.000000e+00> : vector<64x128xf32>
    %74 = tpu.matmul %68, %73, %cst_49 {dimension_numbers = #tpu.dot_dimension_numbers<[1], [0], [0], [1], [0, 0, 1, 1], [], []>} : vector<64x128xbf16>, vector<128x128xbf16>, vector<64x128xf32> -> vector<64x128xf32>
    %c0_50 = arith.constant 0 : index
    %c0_51 = arith.constant 0 : index
    %75 = vector.load %arg2[%c0_50, %c0_51] : memref<128x128xbf16, #tpu.memory_space<vmem>>, vector<128x128xbf16>
    %cst_52 = arith.constant dense<0.000000e+00> : vector<64x128xf32>
    %76 = tpu.matmul %60, %75, %cst_52 {dimension_numbers = #tpu.dot_dimension_numbers<[1], [0], [0], [1], [0, 0, 1, 1], [], []>} : vector<64x128xbf16>, vector<128x128xbf16>, vector<64x128xf32> -> vector<64x128xf32>
    %77 = arith.addf %72, %76 : vector<64x128xf32>
    %78 = math.tanh %77 : vector<64x128xf32>
    %79 = arith.truncf %78 : vector<64x128xf32> to vector<64x128xbf16>
    %c0_53 = arith.constant 0 : index
    %c0_54 = arith.constant 0 : index
    %80 = vector.load %arg3[%c0_53, %c0_54] : memref<128x128xbf16, #tpu.memory_space<vmem>>, vector<128x128xbf16>
    %cst_55 = arith.constant dense<0.000000e+00> : vector<64x128xf32>
    %81 = tpu.matmul %79, %80, %cst_55 {dimension_numbers = #tpu.dot_dimension_numbers<[1], [0], [0], [1], [0, 0, 1, 1], [], []>} : vector<64x128xbf16>, vector<128x128xbf16>, vector<64x128xf32> -> vector<64x128xf32>
    %82 = arith.addf %81, %74 : vector<64x128xf32>
    %c0_56 = arith.constant 0 : index
    %c0_57 = arith.constant 0 : index
    %83 = vector.load %arg5[%c0_56, %c0_57] : memref<1x128xf32, #tpu.memory_space<vmem>>, vector<1x128xf32>
    %84 = vector.broadcast %83 : vector<1x128xf32> to vector<64x128xf32>
    %85 = arith.addf %82, %84 : vector<64x128xf32>
    %86 = math.tanh %85 : vector<64x128xf32>
    %87 = arith.truncf %86 : vector<64x128xf32> to vector<64x128xbf16>
    %c4_i32 = arith.constant 4 : i32
    %c64_i32_58 = arith.constant 64 : i32
    %88 = arith.muli %c4_i32, %c64_i32_58 : i32
    %89 = tpu.assume_multiple %88, 64 : i32
    %90 = arith.index_cast %89 : i32 to index
    %c0_59 = arith.constant 0 : index
    %91 = vector.load %arg9[%90, %c0_59] : memref<448x128xf32, #tpu.memory_space<vmem>>, vector<64x128xf32>
    %c0_60 = arith.constant 0 : index
    %c0_61 = arith.constant 0 : index
    %92 = vector.load %arg4[%c0_60, %c0_61] : memref<128x128xbf16, #tpu.memory_space<vmem>>, vector<128x128xbf16>
    %cst_62 = arith.constant dense<0.000000e+00> : vector<64x128xf32>
    %93 = tpu.matmul %87, %92, %cst_62 {dimension_numbers = #tpu.dot_dimension_numbers<[1], [0], [0], [1], [0, 0, 1, 1], [], []>} : vector<64x128xbf16>, vector<128x128xbf16>, vector<64x128xf32> -> vector<64x128xf32>
    %c0_63 = arith.constant 0 : index
    %c0_64 = arith.constant 0 : index
    %94 = vector.load %arg2[%c0_63, %c0_64] : memref<128x128xbf16, #tpu.memory_space<vmem>>, vector<128x128xbf16>
    %cst_65 = arith.constant dense<0.000000e+00> : vector<64x128xf32>
    %95 = tpu.matmul %79, %94, %cst_65 {dimension_numbers = #tpu.dot_dimension_numbers<[1], [0], [0], [1], [0, 0, 1, 1], [], []>} : vector<64x128xbf16>, vector<128x128xbf16>, vector<64x128xf32> -> vector<64x128xf32>
    %96 = arith.addf %91, %95 : vector<64x128xf32>
    %97 = math.tanh %96 : vector<64x128xf32>
    %98 = arith.truncf %97 : vector<64x128xf32> to vector<64x128xbf16>
    %c0_66 = arith.constant 0 : index
    %c0_67 = arith.constant 0 : index
    %99 = vector.load %arg3[%c0_66, %c0_67] : memref<128x128xbf16, #tpu.memory_space<vmem>>, vector<128x128xbf16>
    %cst_68 = arith.constant dense<0.000000e+00> : vector<64x128xf32>
    %100 = tpu.matmul %98, %99, %cst_68 {dimension_numbers = #tpu.dot_dimension_numbers<[1], [0], [0], [1], [0, 0, 1, 1], [], []>} : vector<64x128xbf16>, vector<128x128xbf16>, vector<64x128xf32> -> vector<64x128xf32>
    %101 = arith.addf %100, %93 : vector<64x128xf32>
    %c0_69 = arith.constant 0 : index
    %c0_70 = arith.constant 0 : index
    %102 = vector.load %arg5[%c0_69, %c0_70] : memref<1x128xf32, #tpu.memory_space<vmem>>, vector<1x128xf32>
    %103 = vector.broadcast %102 : vector<1x128xf32> to vector<64x128xf32>
    %104 = arith.addf %101, %103 : vector<64x128xf32>
    %105 = math.tanh %104 : vector<64x128xf32>
    %106 = arith.truncf %105 : vector<64x128xf32> to vector<64x128xbf16>
    %c5_i32 = arith.constant 5 : i32
    %c64_i32_71 = arith.constant 64 : i32
    %107 = arith.muli %c5_i32, %c64_i32_71 : i32
    %108 = tpu.assume_multiple %107, 64 : i32
    %109 = arith.index_cast %108 : i32 to index
    %c0_72 = arith.constant 0 : index
    %110 = vector.load %arg9[%109, %c0_72] : memref<448x128xf32, #tpu.memory_space<vmem>>, vector<64x128xf32>
    %c0_73 = arith.constant 0 : index
    %c0_74 = arith.constant 0 : index
    %111 = vector.load %arg4[%c0_73, %c0_74] : memref<128x128xbf16, #tpu.memory_space<vmem>>, vector<128x128xbf16>
    %cst_75 = arith.constant dense<0.000000e+00> : vector<64x128xf32>
    %112 = tpu.matmul %106, %111, %cst_75 {dimension_numbers = #tpu.dot_dimension_numbers<[1], [0], [0], [1], [0, 0, 1, 1], [], []>} : vector<64x128xbf16>, vector<128x128xbf16>, vector<64x128xf32> -> vector<64x128xf32>
    %c0_76 = arith.constant 0 : index
    %c0_77 = arith.constant 0 : index
    %113 = vector.load %arg2[%c0_76, %c0_77] : memref<128x128xbf16, #tpu.memory_space<vmem>>, vector<128x128xbf16>
    %cst_78 = arith.constant dense<0.000000e+00> : vector<64x128xf32>
    %114 = tpu.matmul %98, %113, %cst_78 {dimension_numbers = #tpu.dot_dimension_numbers<[1], [0], [0], [1], [0, 0, 1, 1], [], []>} : vector<64x128xbf16>, vector<128x128xbf16>, vector<64x128xf32> -> vector<64x128xf32>
    %115 = arith.addf %110, %114 : vector<64x128xf32>
    %116 = math.tanh %115 : vector<64x128xf32>
    %117 = arith.truncf %116 : vector<64x128xf32> to vector<64x128xbf16>
    %c0_79 = arith.constant 0 : index
    %c0_80 = arith.constant 0 : index
    %118 = vector.load %arg3[%c0_79, %c0_80] : memref<128x128xbf16, #tpu.memory_space<vmem>>, vector<128x128xbf16>
    %cst_81 = arith.constant dense<0.000000e+00> : vector<64x128xf32>
    %119 = tpu.matmul %117, %118, %cst_81 {dimension_numbers = #tpu.dot_dimension_numbers<[1], [0], [0], [1], [0, 0, 1, 1], [], []>} : vector<64x128xbf16>, vector<128x128xbf16>, vector<64x128xf32> -> vector<64x128xf32>
    %120 = arith.addf %119, %112 : vector<64x128xf32>
    %c0_82 = arith.constant 0 : index
    %c0_83 = arith.constant 0 : index
    %121 = vector.load %arg5[%c0_82, %c0_83] : memref<1x128xf32, #tpu.memory_space<vmem>>, vector<1x128xf32>
    %122 = vector.broadcast %121 : vector<1x128xf32> to vector<64x128xf32>
    %123 = arith.addf %120, %122 : vector<64x128xf32>
    %124 = math.tanh %123 : vector<64x128xf32>
    %125 = arith.truncf %124 : vector<64x128xf32> to vector<64x128xbf16>
    %c6_i32 = arith.constant 6 : i32
    %c64_i32_84 = arith.constant 64 : i32
    %126 = arith.muli %c6_i32, %c64_i32_84 : i32
    %127 = tpu.assume_multiple %126, 64 : i32
    %128 = arith.index_cast %127 : i32 to index
    %c0_85 = arith.constant 0 : index
    %129 = vector.load %arg9[%128, %c0_85] : memref<448x128xf32, #tpu.memory_space<vmem>>, vector<64x128xf32>
    %c0_86 = arith.constant 0 : index
    %c0_87 = arith.constant 0 : index
    %130 = vector.load %arg4[%c0_86, %c0_87] : memref<128x128xbf16, #tpu.memory_space<vmem>>, vector<128x128xbf16>
    %cst_88 = arith.constant dense<0.000000e+00> : vector<64x128xf32>
    %131 = tpu.matmul %125, %130, %cst_88 {dimension_numbers = #tpu.dot_dimension_numbers<[1], [0], [0], [1], [0, 0, 1, 1], [], []>} : vector<64x128xbf16>, vector<128x128xbf16>, vector<64x128xf32> -> vector<64x128xf32>
    %c0_89 = arith.constant 0 : index
    %c0_90 = arith.constant 0 : index
    %132 = vector.load %arg2[%c0_89, %c0_90] : memref<128x128xbf16, #tpu.memory_space<vmem>>, vector<128x128xbf16>
    %cst_91 = arith.constant dense<0.000000e+00> : vector<64x128xf32>
    %133 = tpu.matmul %117, %132, %cst_91 {dimension_numbers = #tpu.dot_dimension_numbers<[1], [0], [0], [1], [0, 0, 1, 1], [], []>} : vector<64x128xbf16>, vector<128x128xbf16>, vector<64x128xf32> -> vector<64x128xf32>
    %134 = arith.addf %129, %133 : vector<64x128xf32>
    %135 = math.tanh %134 : vector<64x128xf32>
    %136 = arith.truncf %135 : vector<64x128xf32> to vector<64x128xbf16>
    %c0_92 = arith.constant 0 : index
    %c0_93 = arith.constant 0 : index
    %137 = vector.load %arg3[%c0_92, %c0_93] : memref<128x128xbf16, #tpu.memory_space<vmem>>, vector<128x128xbf16>
    %cst_94 = arith.constant dense<0.000000e+00> : vector<64x128xf32>
    %138 = tpu.matmul %136, %137, %cst_94 {dimension_numbers = #tpu.dot_dimension_numbers<[1], [0], [0], [1], [0, 0, 1, 1], [], []>} : vector<64x128xbf16>, vector<128x128xbf16>, vector<64x128xf32> -> vector<64x128xf32>
    %139 = arith.addf %138, %131 : vector<64x128xf32>
    %c0_95 = arith.constant 0 : index
    %c0_96 = arith.constant 0 : index
    %140 = vector.load %arg5[%c0_95, %c0_96] : memref<1x128xf32, #tpu.memory_space<vmem>>, vector<1x128xf32>
    %141 = vector.broadcast %140 : vector<1x128xf32> to vector<64x128xf32>
    %142 = arith.addf %139, %141 : vector<64x128xf32>
    %143 = math.tanh %142 : vector<64x128xf32>
    %144 = arith.truncf %143 : vector<64x128xf32> to vector<64x128xbf16>
    %c7_i32 = arith.constant 7 : i32
    %c0_97 = arith.constant 0 : index
    %c0_98 = arith.constant 0 : index
    %145 = vector.load %arg6[%c0_97, %c0_98] : memref<128x128xbf16, #tpu.memory_space<vmem>>, vector<128x128xbf16>
    %cst_99 = arith.constant dense<0.000000e+00> : vector<64x128xf32>
    %146 = tpu.matmul %144, %145, %cst_99 {dimension_numbers = #tpu.dot_dimension_numbers<[1], [0], [0], [1], [0, 0, 1, 1], [], []>} : vector<64x128xbf16>, vector<128x128xbf16>, vector<64x128xf32> -> vector<64x128xf32>
    %c0_100 = arith.constant 0 : index
    %c0_101 = arith.constant 0 : index
    %147 = vector.load %arg7[%c0_100, %c0_101] : memref<1x128xf32, #tpu.memory_space<vmem>>, vector<1x128xf32>
    %148 = vector.broadcast %147 : vector<1x128xf32> to vector<64x128xf32>
    %149 = arith.addf %146, %148 : vector<64x128xf32>
    %c0_102 = arith.constant 0 : index
    %c0_103 = arith.constant 0 : index
    %150 = vector.load %arg8[%c0_102, %c0_103] : memref<64x128xf32, #tpu.memory_space<vmem>>, vector<64x128xf32>
    tpu.vector_store %arg8[%c0_102, %c0_103], %149 {strides = array<i32>} : memref<64x128xf32, #tpu.memory_space<vmem>>, vector<64x128xf32>,
    return
  }
}

</mosaic_0001>

<bundles_post_ra>
// kernel: tpu_custom_call.1
= control target key start
LH: loop header
LB: loop body
LE: loop exit
PB: predicated region body
PF: predicated region fallthrough
CT: control target
= control target key end

     0   :  { %v4281_v2 = vmov 0   ;;  %s5463_s0 = inlined_call_operand.vmem [shape: s32[448,1], index: 0, kind: input, shape index: {}]   ;;  %s5464_s1 = inlined_call_operand.vmem [shape: bf16[128,128], index: 1, kind: input, shape index: {}]   ;;  %s5465_s2 = inlined_call_operand.vmem [shape: bf16[128,128], index: 2, kind: input, shape index: {}]   ;;  %s5466_s3 = inlined_call_operand.vmem [shape: bf16[128,128], index: 3, kind: input, shape index: {}]   ;;  %s5467_s4 = inlined_call_operand.vmem [shape: bf16[128,128], index: 4, kind: input, shape index: {}]   ;;  %s5468_s5 = inlined_call_operand.vmem [shape: f32[1,128], index: 5, kind: input, shape index: {}]   ;;  %s5469_s6 = inlined_call_operand.vmem [shape: bf16[128,128], index: 6, kind: input, shape index: {}]   ;;  %s5470_s7 = inlined_call_operand.vmem [shape: f32[1,128], index: 7, kind: input, shape index: {}]   ;;  %s5471_s8 = inlined_call_operand.hbm [shape: f32[64,128], index: 8, kind: output, shape index: {}]  }
   0x1   :  { %v33_v0 = vld [vmem:[%s5463_s0 + $0x10] sm:$0xff]  ;;  %v31_v1 = vld [vmem:[%s5463_s0] sm:$0xff]  ;;  %3956 = vset.pattern.permute.xlu1 %v4281_v2  ;;  %3955 = vset.pattern.permute.xlu0 %v4281_v2  ;;  %v34_v3 = vld [vmem:[%s5463_s0 + $0x18] sm:$0xff] }
   0x2   :  { %96 = vperm.xlu1 %3956, %v33_v0   ;;  %90 = vperm.xlu0 %3955, %v31_v1   ;;  %v32_v4 = vld [vmem:[%s5463_s0 + $0x8] sm:$0xff]  ;;  %v35_v6 = vld [vmem:[%s5463_s0 + $0x20] sm:$0xff]  ;;  %v38_v7 = vld [vmem:[%s5463_s0 + $0x38] sm:$0xff] }
   0x3   :  { %3438 = vmatprep.mubr.bf16.mxu1 %v4281_v2  ;;  %v36_v5 = vld [vmem:[%s5463_s0 + $0x28] sm:$0xff]  ;;  %v37_v8 = vld [vmem:[%s5463_s0 + $0x30] sm:$0xff]  ;;  %v4361_v9 = vld [vmem:[%s5467_s4 + $0x38] sm:$0xff]  }
   0x4   :  { %3422 = vmatprep.subr.bf16.mxu1 %v4361_v9  ;;  %v3958_v10 = vld [vmem:[%s5467_s4 + $0x30] sm:$0xff]   ;;  %v40_v11 = vld [vmem:[%s5463_s0 + $0x48] sm:$0xff]  ;;  %v39_v12 = vld [vmem:[%s5463_s0 + $0x40] sm:$0xff] }
   0x5   :  { %3423 = vmatpush3.bf16.msra.mxu1 %v4361_v9  ;;  %v3959_v13 = vld [vmem:[%s5467_s4 + $0x28] sm:$0xff]   ;;  %v42_v14 = vld [vmem:[%s5463_s0 + $0x58] sm:$0xff]  ;;  %v41_v15 = vld [vmem:[%s5463_s0 + $0x50] sm:$0xff] }
   0x6   :  { %99 = vperm.xlu1 %3956, %v34_v3   ;;  %93 = vperm.xlu0 %3955, %v32_v4   ;;  %v3960_v16 = vld [vmem:[%s5467_s4 + $0x20] sm:$0xff]   ;;  %v44_v17 = vld [vmem:[%s5463_s0 + $0x68] sm:$0xff]  ;;  %v4395_v19 = vld [vmem:[%s5467_s4 + $0x18] sm:$0xff]  }
   0x7   :  { %3424 = vmatprep.subr.bf16.mxu1 %v3958_v10  ;;  %v43_v18 = vld [vmem:[%s5463_s0 + $0x60] sm:$0xff]  ;;  %v46_v20 = vld [vmem:[%s5463_s0 + $0x78] sm:$0xff]  ;;  %v45_v21 = vld [vmem:[%s5463_s0 + $0x70] sm:$0xff] }
   0x8   :  { %v3967_v22 = vld [vmem:[%s5464_s1 + $0x38] sm:$0xff]   ;;  %v4410_v23 = vld [vmem:[%s5467_s4 + $0x10] sm:$0xff]   ;;  %v48_v24 = vld [vmem:[%s5463_s0 + $0x88] sm:$0xff] }
   0x9   :  { %3425 = vmatpush3.bf16.msra.mxu1 %v3958_v10  ;;  %3350 = vmatprep.subr.bf16.mxu0 %v3967_v22  ;;  %v47_v25 = vld [vmem:[%s5463_s0 + $0x80] sm:$0xff]  ;;  %v3969_v26 = vld [vmem:[%s5464_s1 + $0x30] sm:$0xff]   ;;  %v4425_v27 = vld [vmem:[%s5467_s4 + $0x8] sm:$0xff]  }
   0xa   :  { %105 = vperm.xlu1 %3956, %v36_v5   ;;  %102 = vperm.xlu0 %3955, %v35_v6   ;;  %v3971_v28 = vld [vmem:[%s5464_s1 + $0x28] sm:$0xff]   ;;  %v50_v29 = vld [vmem:[%s5463_s0 + $0x98] sm:$0xff]  ;;  %v49_v30 = vld [vmem:[%s5463_s0 + $0x90] sm:$0xff] }
   0xb   :  { %3426 = vmatprep.subr.bf16.mxu1 %v3959_v13  ;;  %3351 = vmatpush3.bf16.msra.mxu0 %v3967_v22  ;;  %v4441_v31 = vld [vmem:[%s5467_s4] sm:$0xff]   ;;  %v52_v33 = vld [vmem:[%s5463_s0 + $0xa8] sm:$0xff]  ;;  %v4457_v35 = vld [vmem:[%s5465_s2 + $0x38] sm:$0xff]  }
   0xc   :  { %3352 = vmatprep.subr.bf16.mxu0 %v3969_v26  ;;  %v3973_v32 = vld [vmem:[%s5464_s1 + $0x20] sm:$0xff]   ;;  %v3975_v36 = vld [vmem:[%s5464_s1 + $0x18] sm:$0xff]   ;;  %v53_v38 = vld [vmem:[%s5463_s0 + $0xb0] sm:$0xff] }
   0xd   :  { %3427 = vmatpush3.bf16.msra.mxu1 %v3959_v13  ;;  %v51_v34 = vld [vmem:[%s5463_s0 + $0xa0] sm:$0xff]  ;;  %v54_v37 = vld [vmem:[%s5463_s0 + $0xb8] sm:$0xff]  ;;  %v4473_v39 = vld [vmem:[%s5465_s2 + $0x30] sm:$0xff]  }
   0xe   :  { %111 = vperm.xlu1 %3956, %v38_v7   ;;  %108 = vperm.xlu0 %3955, %v37_v8   ;;  %v3977_v40 = vld [vmem:[%s5464_s1 + $0x10] sm:$0xff]   ;;  %v56_v41 = vld [vmem:[%s5463_s0 + $0xc8] sm:$0xff]  ;;  %v55_v42 = vld [vmem:[%s5463_s0 + $0xc0] sm:$0xff] }
   0xf   :  { %3428 = vmatprep.subr.bf16.mxu1 %v3960_v16  ;;  %3353 = vmatpush3.bf16.msra.mxu0 %v3969_v26  ;;  %v3979_v43 = vld [vmem:[%s5464_s1 + $0x8] sm:$0xff]   ;;  %v58_v45 = vld [vmem:[%s5463_s0 + $0xd8] sm:$0xff]  ;;  %v57_v46 = vld [vmem:[%s5463_s0 + $0xd0] sm:$0xff] }
  0x10   :  { %3354 = vmatprep.subr.bf16.mxu0 %v3971_v28  ;;  %v4492_v44 = vld [vmem:[%s5465_s2 + $0x28] sm:$0xff]   ;;  %v4506_v47 = vld [vmem:[%s5465_s2 + $0x20] sm:$0xff]  }
  0x11   :  { %3429 = vmatpush3.bf16.msra.mxu1 %v3960_v16  ;;  %v3980_v48 = vld [vmem:[%s5464_s1] sm:$0xff]  }
  0x12   :  { %117 = vperm.xlu1 %3956, %v40_v11   ;;  %114 = vperm.xlu0 %3955, %v39_v12  }
  0x13   :  { %3430 = vmatprep.subr.bf16.mxu1 %v4395_v19  ;;  %3355 = vmatpush3.bf16.msra.mxu0 %v3971_v28 }
  0x14   :  { %3356 = vmatprep.subr.bf16.mxu0 %v3973_v32 }
  0x15   :  { %3431 = vmatpush3.bf16.msra.mxu1 %v4395_v19 }
  0x16   :  { %123 = vperm.xlu1 %3956, %v42_v14   ;;  %120 = vperm.xlu0 %3955, %v41_v15  }
  0x17   :  { %3432 = vmatprep.subr.bf16.mxu1 %v4410_v23  ;;  %3357 = vmatpush3.bf16.msra.mxu0 %v3973_v32 }
  0x18   :  { %3358 = vmatprep.subr.bf16.mxu0 %v3975_v36 }
  0x19   :  { %3433 = vmatpush3.bf16.msra.mxu1 %v4410_v23 }
  0x1a   :  { %129 = vperm.xlu1 %3956, %v44_v17   ;;  %126 = vperm.xlu0 %3955, %v43_v18  }
  0x1b   :  { %3434 = vmatprep.subr.bf16.mxu1 %v4425_v27  ;;  %3359 = vmatpush3.bf16.msra.mxu0 %v3975_v36 }
  0x1c   :  { %3360 = vmatprep.subr.bf16.mxu0 %v3977_v40 }
  0x1d   :  { %3435 = vmatpush3.bf16.msra.mxu1 %v4425_v27 }
  0x1e   :  { %135 = vperm.xlu1 %3956, %v46_v20   ;;  %132 = vperm.xlu0 %3955, %v45_v21  }
  0x1f   :  { %3436 = vmatprep.subr.bf16.mxu1 %v4441_v31  ;;  %3361 = vmatpush3.bf16.msra.mxu0 %v3977_v40 }
  0x20   :  { %3362 = vmatprep.subr.bf16.mxu0 %v3979_v43 }
  0x21   :  { %3437 = vmatpush3.bf16.msra.mxu1 %v4441_v31 }
  0x22   :  { %141 = vperm.xlu1 %3956, %v48_v24   ;;  %138 = vperm.xlu0 %3955, %v47_v25  }
  0x23   :  { %3446 = vmatprep.subr.bf16.mxu1 %v4457_v35 }
  0x24   :  { %3439 = vmatmul.mubr.bf16.vlgmr.msra.gmra.mxu1 %v4281_v2 }
  0x25   :  { %3447 = vmatpush3.bf16.msra.mxu1 %v4457_v35  ;;  %3442 = vmatprep.mubr.bf16.mxu1 %v4281_v2 }
  0x26   :  { %147 = vperm.xlu1 %3956, %v50_v29   ;;  %144 = vperm.xlu0 %3955, %v49_v30  }
  0x27   :  { %3448 = vmatprep.subr.bf16.mxu1 %v4473_v39 }
  0x29   :  { %3449 = vmatpush3.bf16.msra.mxu1 %v4473_v39 }
  0x2a   :  { %153 = vperm.xlu1 %3956, %v52_v33   ;;  %150 = vperm.xlu0 %3955, %v51_v34  }
  0x2b   :  { %3450 = vmatprep.subr.bf16.mxu1 %v4492_v44 }
  0x2e   :  { %159 = vperm.xlu1 %3956, %v54_v37   ;;  %156 = vperm.xlu0 %3955, %v53_v38  }
  0x32   :  { %165 = vperm.xlu1 %3956, %v56_v41   ;;  %162 = vperm.xlu0 %3955, %v55_v42  }
  0x33   :  { %13 = vsyncpa [#allocation4], 0  ;;  %v60_v49 = vld [vmem:[%s5463_s0 + $0xe8] sm:$0xff]  ;;  %v59_v50 = vld [vmem:[%s5463_s0 + $0xe0] sm:$0xff]  ;;  %3443 = vmatmul.mubr.bf16.gmra.mxu1 %v4281_v2  ;;  %3363 = vmatpush3.bf16.msra.mxu0 %v3979_v43  ;;  %v87_v18 = vlaneseq  ;;  %v4282_v26 = vmov 1.0|1.0  }
  0x34   :  { %3451 = vmatpush3.bf16.msra.mxu1 %v4492_v44  ;;  %3462 = vmatprep.mubr.bf16.mxu1 %v4281_v2  ;;  %v4526_v51 = vld [vmem:[%s5465_s2 + $0x18] sm:$0xff]   ;;  %v61_v53 = vld [vmem:[%s5463_s0 + $0xf0] sm:$0xff]  ;;  %v64_v55 = vld [vmem:[%s5463_s0 + $0x108] sm:$0xff]  ;;  %s4283_s15 = smov [#allocation3]  }
  0x35   :  { %3452 = vmatprep.subr.bf16.mxu1 %v4506_v47  ;;  %3364 = vmatprep.subr.bf16.mxu0 %v3980_v48  ;;  %v62_v52 = vld [vmem:[%s5463_s0 + $0xf8] sm:$0xff]  ;;  %v4540_v54 = vld [vmem:[%s5465_s2 + $0x10] sm:$0xff]   ;;  %v63_v56 = vld [vmem:[%s5463_s0 + $0x100] sm:$0xff]  ;;  %v4634_v22 = vand.u32 127, %v87_v18  ;;  %s2885_s16 = sshll.u32 %s4283_s15, 4  ;;  %s2886_s16 = int_to_ptr.vmem [resolvable:$true] %s2885_s16 }
  0x36   :  { %171 = vperm.xlu1 %3956, %v58_v45   ;;  %168 = vperm.xlu0 %3955, %v57_v46   ;;  %v4553_v57 = vld [vmem:[%s5465_s2 + $0x8] sm:$0xff]   ;;  %v66_v58 = vld [vmem:[%s5463_s0 + $0x118] sm:$0xff]  ;;  %v65_v59 = vld [vmem:[%s5463_s0 + $0x110] sm:$0xff]  ;;  %p4264_p1 = scmp.lt.s32.totalorder %s2886_s16, %s2886_s16 }
  0x37   :  { %3365 = vmatpush3.bf16.msra.mxu0 %v3980_v48  ;;  %v4566_v60 = vld [vmem:[%s5465_s2] sm:$0xff]   ;;  %v68_v61 = vld [vmem:[%s5463_s0 + $0x128] sm:$0xff]  ;;  %v70_v63 = vld [vmem:[%s5463_s0 + $0x138] sm:$0xff] }
  0x38   :  { %3453 = vmatpush3.bf16.msra.mxu1 %v4506_v47  ;;  %3518 = vmatprep.subr.bf16.mxu0 %v4457_v35  ;;  %v67_v62 = vld [vmem:[%s5463_s0 + $0x120] sm:$0xff]  ;;  %v69_v0 = vld [vmem:[%s5463_s0 + $0x130] sm:$0xff]  ;;  %v72_v1 = vld [vmem:[%s5463_s0 + $0x148] sm:$0xff] }
  0x39   :  { %3454 = vmatprep.subr.bf16.mxu1 %v4526_v51  ;;  %v71_v3 = vld [vmem:[%s5463_s0 + $0x140] sm:$0xff]  ;;  %v74_v4 = vld [vmem:[%s5463_s0 + $0x158] sm:$0xff]  ;;  %v73_v5 = vld [vmem:[%s5463_s0 + $0x150] sm:$0xff] }
  0x3a   :  { %177 = vperm.xlu1 %3956, %v60_v49   ;;  %174 = vperm.xlu0 %3955, %v59_v50   ;;  %v76_v6 = vld [vmem:[%s5463_s0 + $0x168] sm:$0xff]  ;;  %v75_v7 = vld [vmem:[%s5463_s0 + $0x160] sm:$0xff]  ;;  %v78_v8 = vld [vmem:[%s5463_s0 + $0x178] sm:$0xff] }
  0x3b   :  { %v77_v10 = vld [vmem:[%s5463_s0 + $0x170] sm:$0xff]  ;;  %v80_v11 = vld [vmem:[%s5463_s0 + $0x188] sm:$0xff]  ;;  %v82_v12 = vld [vmem:[%s5463_s0 + $0x198] sm:$0xff] }
  0x3c   :  { %3455 = vmatpush3.bf16.msra.mxu1 %v4526_v51  ;;  %v81_v13 = vld [vmem:[%s5463_s0 + $0x190] sm:$0xff]  ;;  %v84_v14 = vld [vmem:[%s5463_s0 + $0x1a8] sm:$0xff]  ;;  %v83_v15 = vld [vmem:[%s5463_s0 + $0x1a0] sm:$0xff] }
  0x3d   :  { %3456 = vmatprep.subr.bf16.mxu1 %v4540_v54  ;;  %v86_v16 = vld [vmem:[%s5463_s0 + $0x1b8] sm:$0xff]  ;;  %v85_v17 = vld [vmem:[%s5463_s0 + $0x1b0] sm:$0xff] }
  0x3e   :  { %183 = vperm.xlu1 %3956, %v62_v52   ;;  %180 = vperm.xlu0 %3955, %v61_v53   ;;  %v4670_v38 = vld [vmem:[%s5466_s3 + $0x30] sm:$0xff]  }
  0x40   :  { %3457 = vmatpush3.bf16.msra.mxu1 %v4540_v54 }
  0x41   :  { %3458 = vmatprep.subr.bf16.mxu1 %v4553_v57 }
  0x42   :  { %189 = vperm.xlu1 %3956, %v64_v55   ;;  %186 = vperm.xlu0 %3955, %v63_v56  }
  0x44   :  { %3459 = vmatpush3.bf16.msra.mxu1 %v4553_v57 }
  0x45   :  { %3460 = vmatprep.subr.bf16.mxu1 %v4566_v60 }
  0x46   :  { %195 = vperm.xlu1 %3956, %v66_v58   ;;  %192 = vperm.xlu0 %3955, %v65_v59  }
  0x48   :  { %3461 = vmatpush3.bf16.msra.mxu1 %v4566_v60 }
  0x4a   :  { %201 = vperm.xlu1 %3956, %v68_v61   ;;  %198 = vperm.xlu0 %3955, %v67_v62  }
  0x4b   :  { %3463 = vmatmul.mubr.bf16.vlgmr.msra.gmra.mxu1 %v4281_v2 }
  0x4c   :  { %3466 = vmatprep.mubr.bf16.mxu1 %v4281_v2 }
  0x4e   :  { %207 = vperm.xlu1 %3956, %v70_v63   ;;  %204 = vperm.xlu0 %3955, %v69_v0  }
  0x52   :  { %213 = vperm.xlu1 %3956, %v72_v1   ;;  %210 = vperm.xlu0 %3955, %v71_v3   ;;  %v4725_v1 = vld [vmem:[%s5466_s3 + $0x28] sm:$0xff]  }
  0x53   :  { %3467 = vmatmul.mubr.bf16.gmra.mxu1 %v4281_v2  ;;  %v79_v2 = vld [vmem:[%s5463_s0 + $0x180] sm:$0xff] }
  0x56   :  { %219 = vperm.xlu1 %3956, %v74_v4   ;;  %216 = vperm.xlu0 %3955, %v73_v5   ;;  %v4735_v5 = vld [vmem:[%s5466_s3 + $0x20] sm:$0xff]  }
  0x5a   :  { %225 = vperm.xlu1 %3956, %v76_v6   ;;  %222 = vperm.xlu0 %3955, %v75_v7  }
  0x5e   :  { %231 = vperm.xlu1 %3956, %v78_v8   ;;  %228 = vperm.xlu0 %3955, %v77_v10   ;;  %v4745_v8 = vld [vmem:[%s5466_s3 + $0x18] sm:$0xff]  }
  0x62   :  { %237 = vperm.xlu1 %3956, %v80_v11   ;;  %234 = vperm.xlu0 %3955, %v79_v2   ;;  %v4755_v2 = vld [vmem:[%s5466_s3 + $0x10] sm:$0xff]  }
  0x66   :  { %243 = vperm.xlu1 %3956, %v82_v12   ;;  %240 = vperm.xlu0 %3955, %v81_v13  }
  0x6a   :  { %249 = vperm.xlu1 %3956, %v84_v14   ;;  %246 = vperm.xlu0 %3955, %v83_v15   ;;  %v4765_v14 = vld [vmem:[%s5466_s3 + $0x8] sm:$0xff]  }
  0x6e   :  { %255 = vperm.xlu1 %3956, %v86_v16   ;;  %252 = vperm.xlu0 %3955, %v85_v17   ;;  %v4775_v17 = vld [vmem:[%s5466_s3] sm:$0xff]  }
  0x7d   :  { %v97_v20 = vpop.permute.xlu1 %96  ;;  %v91_v21 = vpop.permute.xlu0 %90 }
  0x7e   :  { %vm259_vm0 = vcmp.eq.s32.totalorder %v97_v20, %v4634_v22  ;;  %vm257_vm3 = vcmp.eq.s32.totalorder %v91_v21, %v4634_v22 }
  0x81   :  { %v100_v24 = vpop.permute.xlu1 %99  ;;  %v94_v25 = vpop.permute.xlu0 %93 }
  0x82   :  { %vm260_vm1 = vcmp.eq.s32.totalorder %v100_v24, %v4634_v22  ;;  %vm258_vm2 = vcmp.eq.s32.totalorder %v94_v25, %v4634_v22 }
  0x83   :  { %vm2962_vm4 = vmpackc.low %vm260_vm1, %vm259_vm0 }
  0x84   :  { %vm2960_vm5 = vmpackc.low %vm258_vm2, %vm257_vm3 }
  0x85   :  { %3366 = vmatprep.mubr.msk.bf16.mxu0 %vm2960_vm5, %v4282_v26  ;;  %v106_v28 = vpop.permute.xlu1 %105  ;;  %v103_v29 = vpop.permute.xlu0 %102 }
  0x86   :  { %vm262_vm6 = vcmp.eq.s32.totalorder %v106_v28, %v4634_v22  ;;  %3367 = vmatmul.mubr.msk.bf16.vlgmr.msra.gmra.mxu0 %vm2962_vm4, %v4282_v26  ;;  %vm261_vm7 = vcmp.eq.s32.totalorder %v103_v29, %v4634_v22 }
  0x87   :  { %vm2964_vm8 = vmpackc.low %vm262_vm6, %vm261_vm7  ;;  %3519 = vmatpush3.bf16.msra.mxu0 %v4457_v35  ;;  %v4658_v35 = vld [vmem:[%s5466_s3 + $0x38] sm:$0xff]  }
  0x88   :  { %3370 = vmatprep.mubr.msk.bf16.mxu0 %vm2964_vm8, %v4282_v26  ;;  %3520 = vmatprep.subr.bf16.mxu0 %v4473_v39 }
  0x89   :  { %v112_v30 = vpop.permute.xlu1 %111  ;;  %v109_v32 = vpop.permute.xlu0 %108  ;;  %3470 = vmatprep.subr.bf16.mxu1 %v4658_v35 }
  0x8a   :  { %vm264_vm9 = vcmp.eq.s32.totalorder %v112_v30, %v4634_v22  ;;  %vm263_vm10 = vcmp.eq.s32.totalorder %v109_v32, %v4634_v22  ;;  %3471 = vmatpush3.bf16.msra.mxu1 %v4658_v35 }
  0x8b   :  { %vm2966_vm11 = vmpackc.low %vm264_vm9, %vm263_vm10  ;;  %3521 = vmatpush3.bf16.msra.mxu0 %v4473_v39  ;;  %3472 = vmatprep.subr.bf16.mxu1 %v4670_v38 }
  0x8c   :  { %3522 = vmatprep.subr.bf16.mxu0 %v4492_v44 }
  0x8d   :  { %v118_v33 = vpop.permute.xlu1 %117  ;;  %v115_v34 = vpop.permute.xlu0 %114 }
  0x8e   :  { %vm266_vm12 = vcmp.eq.s32.totalorder %v118_v33, %v4634_v22  ;;  %3371 = vmatmul.mubr.msk.bf16.gmra.mxu0 %vm2966_vm11, %v4282_v26  ;;  %vm265_vm13 = vcmp.eq.s32.totalorder %v115_v34, %v4634_v22  ;;  %3473 = vmatpush3.bf16.msra.mxu1 %v4670_v38 }
  0x8f   :  { %vm2968_vm14 = vmpackc.low %vm266_vm12, %vm265_vm13  ;;  %3523 = vmatpush3.bf16.msra.mxu0 %v4492_v44  ;;  %3474 = vmatprep.subr.bf16.mxu1 %v4725_v1 }
  0x90   :  { %3374 = vmatprep.mubr.msk.bf16.mxu0 %vm2968_vm14, %v4282_v26  ;;  %3524 = vmatprep.subr.bf16.mxu0 %v4506_v47 }
  0x91   :  { %v124_v36 = vpop.permute.xlu1 %123  ;;  %v121_v37 = vpop.permute.xlu0 %120 }
  0x92   :  { %vm268_vm15 = vcmp.eq.s32.totalorder %v124_v36, %v4634_v22  ;;  %vm267_vm0 = vcmp.eq.s32.totalorder %v121_v37, %v4634_v22  ;;  %3475 = vmatpush3.bf16.msra.mxu1 %v4725_v1 }
  0x93   :  { %vm2970_vm1 = vmpackc.low %vm268_vm15, %vm267_vm0  ;;  %3525 = vmatpush3.bf16.msra.mxu0 %v4506_v47  ;;  %3476 = vmatprep.subr.bf16.mxu1 %v4735_v5 }
  0x94   :  { %3526 = vmatprep.subr.bf16.mxu0 %v4526_v51 }
  0x95   :  { %v130_v39 = vpop.permute.xlu1 %129  ;;  %v127_v40 = vpop.permute.xlu0 %126 }
  0x96   :  { %vm270_vm2 = vcmp.eq.s32.totalorder %v130_v39, %v4634_v22  ;;  %3375 = vmatmul.mubr.msk.bf16.gmra.mxu0 %vm2970_vm1, %v4282_v26  ;;  %vm269_vm3 = vcmp.eq.s32.totalorder %v127_v40, %v4634_v22  ;;  %3477 = vmatpush3.bf16.msra.mxu1 %v4735_v5 }
  0x97   :  { %vm2972_vm4 = vmpackc.low %vm270_vm2, %vm269_vm3  ;;  %3527 = vmatpush3.bf16.msra.mxu0 %v4526_v51  ;;  %3478 = vmatprep.subr.bf16.mxu1 %v4745_v8 }
  0x98   :  { %3378 = vmatprep.mubr.msk.bf16.mxu0 %vm2972_vm4, %v4282_v26  ;;  %3528 = vmatprep.subr.bf16.mxu0 %v4540_v54 }
  0x99   :  { %v136_v41 = vpop.permute.xlu1 %135  ;;  %v133_v42 = vpop.permute.xlu0 %132 }
  0x9a   :  { %vm272_vm5 = vcmp.eq.s32.totalorder %v136_v41, %v4634_v22  ;;  %vm271_vm6 = vcmp.eq.s32.totalorder %v133_v42, %v4634_v22  ;;  %3479 = vmatpush3.bf16.msra.mxu1 %v4745_v8 }
  0x9b   :  { %vm2974_vm7 = vmpackc.low %vm272_vm5, %vm271_vm6  ;;  %3529 = vmatpush3.bf16.msra.mxu0 %v4540_v54  ;;  %3480 = vmatprep.subr.bf16.mxu1 %v4755_v2 }
  0x9c   :  { %3530 = vmatprep.subr.bf16.mxu0 %v4553_v57 }
  0x9d   :  { %v142_v43 = vpop.permute.xlu1 %141  ;;  %v139_v44 = vpop.permute.xlu0 %138 }
  0x9e   :  { %vm274_vm8 = vcmp.eq.s32.totalorder %v142_v43, %v4634_v22  ;;  %3379 = vmatmul.mubr.msk.bf16.gmra.mxu0 %vm2974_vm7, %v4282_v26  ;;  %vm273_vm9 = vcmp.eq.s32.totalorder %v139_v44, %v4634_v22  ;;  %3481 = vmatpush3.bf16.msra.mxu1 %v4755_v2 }
  0x9f   :  { %vm2976_vm10 = vmpackc.low %vm274_vm8, %vm273_vm9  ;;  %3531 = vmatpush3.bf16.msra.mxu0 %v4553_v57  ;;  %3482 = vmatprep.subr.bf16.mxu1 %v4765_v14 }
  0xa0   :  { %3382 = vmatprep.mubr.msk.bf16.mxu0 %vm2976_vm10, %v4282_v26  ;;  %3532 = vmatprep.subr.bf16.mxu0 %v4566_v60 }
  0xa1   :  { %v148_v45 = vpop.permute.xlu1 %147  ;;  %v145_v46 = vpop.permute.xlu0 %144 }
  0xa2   :  { %vm276_vm11 = vcmp.eq.s32.totalorder %v148_v45, %v4634_v22  ;;  %vm275_vm12 = vcmp.eq.s32.totalorder %v145_v46, %v4634_v22  ;;  %3483 = vmatpush3.bf16.msra.mxu1 %v4765_v14 }
  0xa3   :  { %vm2978_vm13 = vmpackc.low %vm276_vm11, %vm275_vm12  ;;  %3533 = vmatpush3.bf16.msra.mxu0 %v4566_v60  ;;  %3484 = vmatprep.subr.bf16.mxu1 %v4775_v17 }
  0xa4   :  { %3566 = vmatprep.subr.bf16.mxu0 %v4361_v9 }
  0xa5   :  { %v154_v47 = vpop.permute.xlu1 %153  ;;  %v151_v48 = vpop.permute.xlu0 %150 }
  0xa6   :  { %vm278_vm14 = vcmp.eq.s32.totalorder %v154_v47, %v4634_v22  ;;  %3383 = vmatmul.mubr.msk.bf16.gmra.mxu0 %vm2978_vm13, %v4282_v26  ;;  %vm277_vm15 = vcmp.eq.s32.totalorder %v151_v48, %v4634_v22  ;;  %3485 = vmatpush3.bf16.msra.mxu1 %v4775_v17 }
  0xa7   :  { %vm2980_vm0 = vmpackc.low %vm278_vm14, %vm277_vm15  ;;  %3494 = vmatprep.subr.bf16.mxu1 %v4361_v9 }
  0xa8   :  { %3386 = vmatprep.mubr.msk.bf16.mxu0 %vm2980_vm0, %v4282_v26 }
  0xa9   :  { %v160_v49 = vpop.permute.xlu1 %159  ;;  %v157_v50 = vpop.permute.xlu0 %156 }
  0xaa   :  { %vm280_vm1 = vcmp.eq.s32.totalorder %v160_v49, %v4634_v22  ;;  %vm279_vm2 = vcmp.eq.s32.totalorder %v157_v50, %v4634_v22 }
  0xab   :  { %vm2982_vm3 = vmpackc.low %vm280_vm1, %vm279_vm2 }
  0xad   :  { %v166_v51 = vpop.permute.xlu1 %165  ;;  %v163_v52 = vpop.permute.xlu0 %162 }
  0xae   :  { %vm282_vm4 = vcmp.eq.s32.totalorder %v166_v51, %v4634_v22  ;;  %3387 = vmatmul.mubr.msk.bf16.gmra.mxu0 %vm2982_vm3, %v4282_v26  ;;  %vm281_vm5 = vcmp.eq.s32.totalorder %v163_v52, %v4634_v22 }
  0xaf   :  { %vm2984_vm6 = vmpackc.low %vm282_vm4, %vm281_vm5 }
  0xb0   :  { %3390 = vmatprep.mubr.msk.bf16.mxu0 %vm2984_vm6, %v4282_v26 }
  0xb1   :  { %v172_v53 = vpop.permute.xlu1 %171  ;;  %v169_v54 = vpop.permute.xlu0 %168 }
  0xb2   :  { %vm284_vm7 = vcmp.eq.s32.totalorder %v172_v53, %v4634_v22  ;;  %vm283_vm8 = vcmp.eq.s32.totalorder %v169_v54, %v4634_v22 }
  0xb3   :  { %vm2986_vm9 = vmpackc.low %vm284_vm7, %vm283_vm8 }
  0xb5   :  { %v178_v55 = vpop.permute.xlu1 %177  ;;  %v175_v56 = vpop.permute.xlu0 %174 }
  0xb6   :  { %vm286_vm10 = vcmp.eq.s32.totalorder %v178_v55, %v4634_v22  ;;  %3391 = vmatmul.mubr.msk.bf16.gmra.mxu0 %vm2986_vm9, %v4282_v26  ;;  %vm285_vm11 = vcmp.eq.s32.totalorder %v175_v56, %v4634_v22 }
  0xb7   :  { %vm2988_vm12 = vmpackc.low %vm286_vm10, %vm285_vm11 }
  0xb8   :  { %3394 = vmatprep.mubr.msk.bf16.mxu0 %vm2988_vm12, %v4282_v26 }
  0xb9   :  { %v184_v57 = vpop.permute.xlu1 %183  ;;  %v181_v58 = vpop.permute.xlu0 %180 }
  0xba   :  { %vm288_vm13 = vcmp.eq.s32.totalorder %v184_v57, %v4634_v22  ;;  %vm287_vm14 = vcmp.eq.s32.totalorder %v181_v58, %v4634_v22 }
  0xbb   :  { %vm2990_vm15 = vmpackc.low %vm288_vm13, %vm287_vm14 }
  0xbd   :  { %v190_v59 = vpop.permute.xlu1 %189  ;;  %v187_v60 = vpop.permute.xlu0 %186 }
  0xbe   :  { %vm290_vm0 = vcmp.eq.s32.totalorder %v190_v59, %v4634_v22  ;;  %3395 = vmatmul.mubr.msk.bf16.gmra.mxu0 %vm2990_vm15, %v4282_v26  ;;  %vm289_vm1 = vcmp.eq.s32.totalorder %v187_v60, %v4634_v22 }
  0xbf   :  { %vm2992_vm2 = vmpackc.low %vm290_vm0, %vm289_vm1 }
  0xc0   :  { %3398 = vmatprep.mubr.msk.bf16.mxu0 %vm2992_vm2, %v4282_v26 }
  0xc1   :  { %v196_v61 = vpop.permute.xlu1 %195  ;;  %v193_v62 = vpop.permute.xlu0 %192 }
  0xc2   :  { %vm292_vm3 = vcmp.eq.s32.totalorder %v196_v61, %v4634_v22  ;;  %vm291_vm4 = vcmp.eq.s32.totalorder %v193_v62, %v4634_v22 }
  0xc3   :  { %vm2994_vm5 = vmpackc.low %vm292_vm3, %vm291_vm4 }
  0xc5   :  { %v202_v63 = vpop.permute.xlu1 %201  ;;  %v199_v0 = vpop.permute.xlu0 %198 }
  0xc6   :  { %vm294_vm6 = vcmp.eq.s32.totalorder %v202_v63, %v4634_v22  ;;  %3399 = vmatmul.mubr.msk.bf16.gmra.mxu0 %vm2994_vm5, %v4282_v26  ;;  %vm293_vm7 = vcmp.eq.s32.totalorder %v199_v0, %v4634_v22 }
  0xc7   :  { %vm2996_vm8 = vmpackc.low %vm294_vm6, %vm293_vm7 }
  0xc8   :  { %3402 = vmatprep.mubr.msk.bf16.mxu0 %vm2996_vm8, %v4282_v26 }
  0xc9   :  { %v208_v3 = vpop.permute.xlu1 %207  ;;  %v205_v4 = vpop.permute.xlu0 %204 }
  0xca   :  { %vm296_vm9 = vcmp.eq.s32.totalorder %v208_v3, %v4634_v22  ;;  %vm295_vm10 = vcmp.eq.s32.totalorder %v205_v4, %v4634_v22 }
  0xcb   :  { %vm2998_vm11 = vmpackc.low %vm296_vm9, %vm295_vm10 }
  0xcd   :  { %v214_v6 = vpop.permute.xlu1 %213  ;;  %v211_v7 = vpop.permute.xlu0 %210 }
  0xce   :  { %vm298_vm12 = vcmp.eq.s32.totalorder %v214_v6, %v4634_v22  ;;  %3403 = vmatmul.mubr.msk.bf16.gmra.mxu0 %vm2998_vm11, %v4282_v26  ;;  %vm297_vm13 = vcmp.eq.s32.totalorder %v211_v7, %v4634_v22 }
  0xcf   :  { %vm3000_vm14 = vmpackc.low %vm298_vm12, %vm297_vm13 }
  0xd0   :  { %3406 = vmatprep.mubr.msk.bf16.mxu0 %vm3000_vm14, %v4282_v26 }
  0xd1   :  { %v220_v10 = vpop.permute.xlu1 %219  ;;  %v217_v11 = vpop.permute.xlu0 %216 }
  0xd2   :  { %vm300_vm15 = vcmp.eq.s32.totalorder %v220_v10, %v4634_v22  ;;  %vm299_vm0 = vcmp.eq.s32.totalorder %v217_v11, %v4634_v22  ;;  %v4812_v10 = vld [vmem:[%s5467_s4 + $0x38] sm:$0xff]  }
  0xd3   :  { %vm3002_vm1 = vmpackc.low %vm300_vm15, %vm299_vm0 }
  0xd5   :  { %v226_v12 = vpop.permute.xlu1 %225  ;;  %v223_v13 = vpop.permute.xlu0 %222 }
  0xd6   :  { %vm302_vm2 = vcmp.eq.s32.totalorder %v226_v12, %v4634_v22  ;;  %3407 = vmatmul.mubr.msk.bf16.gmra.mxu0 %vm3002_vm1, %v4282_v26  ;;  %vm301_vm3 = vcmp.eq.s32.totalorder %v223_v13, %v4634_v22  ;;  %v4821_v13 = vld [vmem:[%s5467_s4 + $0x30] sm:$0xff]  }
  0xd7   :  { %vm3004_vm4 = vmpackc.low %vm302_vm2, %vm301_vm3 }
  0xd8   :  { %3410 = vmatprep.mubr.msk.bf16.mxu0 %vm3004_vm4, %v4282_v26 }
  0xd9   :  { %v232_v15 = vpop.permute.xlu1 %231  ;;  %v229_v16 = vpop.permute.xlu0 %228 }
  0xda   :  { %vm304_vm5 = vcmp.eq.s32.totalorder %v232_v15, %v4634_v22  ;;  %vm303_vm6 = vcmp.eq.s32.totalorder %v229_v16, %v4634_v22 }
  0xdb   :  { %vm3006_vm7 = vmpackc.low %vm304_vm5, %vm303_vm6 }
  0xdd   :  { %v238_v18 = vpop.permute.xlu1 %237  ;;  %v235_v20 = vpop.permute.xlu0 %234 }
  0xde   :  { %vm306_vm8 = vcmp.eq.s32.totalorder %v238_v18, %v4634_v22  ;;  %3411 = vmatmul.mubr.msk.bf16.gmra.mxu0 %vm3006_vm7, %v4282_v26  ;;  %vm305_vm9 = vcmp.eq.s32.totalorder %v235_v20, %v4634_v22 }
  0xdf   :  { %vm3008_vm10 = vmpackc.low %vm306_vm8, %vm305_vm9 }
  0xe0   :  { %3414 = vmatprep.mubr.msk.bf16.mxu0 %vm3008_vm10, %v4282_v26 }
  0xe1   :  { %v244_v21 = vpop.permute.xlu1 %243  ;;  %v241_v24 = vpop.permute.xlu0 %240 }
  0xe2   :  { %vm308_vm11 = vcmp.eq.s32.totalorder %v244_v21, %v4634_v22  ;;  %vm307_vm12 = vcmp.eq.s32.totalorder %v241_v24, %v4634_v22 }
  0xe3   :  { %vm3010_vm13 = vmpackc.low %vm308_vm11, %vm307_vm12 }
  0xe4   :  { %v4793_v30 = vpop.f32.mrf.mxu1 }
  0xe5   :  { %v250_v25 = vpop.permute.xlu1 %249  ;;  %v247_v28 = vpop.permute.xlu0 %246 }
  0xe6   :  { %vm310_vm14 = vcmp.eq.s32.totalorder %v250_v25, %v4634_v22  ;;  %3415 = vmatmul.mubr.msk.bf16.gmra.mxu0 %vm3010_vm13, %v4282_v26  ;;  %vm309_vm15 = vcmp.eq.s32.totalorder %v247_v28, %v4634_v22  ;;  %v4795_v32 = vpop.f32.mrf.mxu1  ;;  %v4832_v25 = vld [vmem:[%s5467_s4 + $0x28] sm:$0xff]  }
  0xe7   :  { %vm3012_vm0 = vmpackc.low %vm310_vm14, %vm309_vm15 }
  0xe8   :  { %3418 = vmatprep.mubr.msk.bf16.mxu0 %vm3012_vm0, %v4282_v26  ;;  %v4797_v33 = vpop.f32.mrf.mxu1 }
  0xe9   :  { %v256_v9 = vpop.permute.xlu1 %255  ;;  %v253_v29 = vpop.permute.xlu0 %252 }
  0xea   :  { %vm312_vm1 = vcmp.eq.s32.totalorder %v256_v9, %v4634_v22  ;;  %vm311_vm2 = vcmp.eq.s32.totalorder %v253_v29, %v4634_v22  ;;  %v4799_v34 = vpop.f32.mrf.mxu1  ;;  %v4843_v9 = vld [vmem:[%s5467_s4 + $0x20] sm:$0xff]  }
  0xeb   :  { %vm3014_vm3 = vmpackc.low %vm312_vm1, %vm311_vm2 }
  0xee   :  { %3419 = vmatmul.mubr.msk.bf16.gmra.mxu0 %vm3014_vm3, %v4282_v26 }
  0xf3   :  { %v4801_v36 = vpop.f32.mrf.mxu1 }
  0xf5   :  { %v4803_v37 = vpop.f32.mrf.mxu1 }
  0xf7   :  { %v4805_v39 = vpop.f32.mrf.mxu1 }
  0xf9   :  { %v4807_v40 = vpop.f32.mrf.mxu1 }
 0x10b   :  { %v3464_v22 = vpop.f32.mrf.mxu1 }
 0x10d   :  { %v1065_v41 = vpop.f32.mrf.mxu1 }
 0x10f   :  { %v3465_v42 = vpop.f32.mrf.mxu1 }
 0x111   :  { %v1068_v26 = vpop.f32.mrf.mxu1 }
 0x113   :  { %v3468_v44 = vpop.f32.mrf.mxu1 }
 0x115   :  { %v1081_v48 = vpop.f32.mrf.mxu1 }
 0x117   :  { %v3469_v54 = vpop.f32.mrf.mxu1 }
 0x119   :  { %v1084_v58 = vpop.f32.mrf.mxu1 }
 0x146   :  { %v3368_v43 = vpop.f32.mrf.mxu0 }
 0x147   :  { %v1098_v50 = vadd.f32 %v3464_v22, %v3368_v43  ;;  %v4856_v22 = vld [vmem:[%s5467_s4 + $0x18] sm:$0xff]  }
 0x148   :  { %v551_v45 = vpop.f32.mrf.mxu0 }
 0x149   :  { %v1096_v46 = vadd.f32 %v1065_v41, %v551_v45 }
 0x14a   :  { %v3369_v47 = vpop.f32.mrf.mxu0 }
 0x14b   :  { %v1099_v49 = vadd.f32 %v3465_v42, %v3369_v47  ;;  %3997 = vtanh.f32 %v1096_v46 }
 0x14c   :  { %v554_v51 = vpop.f32.mrf.mxu0 }
 0x14d   :  { %v1097_v52 = vadd.f32 %v1068_v26, %v554_v51  ;;  %3999 = vtanh.f32 %v1099_v49 }
 0x14e   :  { %v3372_v53 = vpop.f32.mrf.mxu0 }
 0x14f   :  { %4001 = vtanh.f32 %v1097_v52  ;;  %v1102_v60 = vadd.f32 %v3468_v44, %v3372_v53 }
 0x150   :  { %4003 = vtanh.f32 %v1098_v50  ;;  %v567_v55 = vpop.f32.mrf.mxu0 }
 0x151   :  { %v1100_v56 = vadd.f32 %v1081_v48, %v567_v55 }
 0x152   :  { %v3373_v57 = vpop.f32.mrf.mxu0 }
 0x153   :  { %v1103_v59 = vadd.f32 %v3469_v54, %v3373_v57  ;;  %4005 = vtanh.f32 %v1100_v56 }
 0x154   :  { %v570_v61 = vpop.f32.mrf.mxu0 }
 0x155   :  { %v1101_v62 = vadd.f32 %v1084_v58, %v570_v61  ;;  %4007 = vtanh.f32 %v1103_v59 }
 0x156   :  { %v4816_v12 = vpop.f32.mrf.mxu0 }
 0x157   :  { %4009 = vtanh.f32 %v1101_v62 }
 0x158   :  { %4011 = vtanh.f32 %v1102_v60  ;;  %v3998_v63 = vpop.eup %3997  ;;  %v4827_v21 = vpop.f32.mrf.mxu0 }
 0x15a   :  { %v4000_v0 = vpop.eup %3999  ;;  %v4838_v28 = vpop.f32.mrf.mxu0 }
 0x15c   :  { %v4002_v3 = vpop.eup %4001  ;;  %v4849_v29 = vpop.f32.mrf.mxu0 }
 0x15d   :  { %v4004_v4 = vpop.eup %4003  ;;  %v1112_v6 = vpack.c.bf16 %v4002_v3, %v3998_v63 }
 0x15e   :  { %v1113_v7 = vpack.c.bf16 %v4000_v0, %v4004_v4  ;;  %v4860_v41 = vpop.f32.mrf.mxu0 }
 0x15f   :  { %3486 = vmatprep.mubr.bf16.mxu1 %v1112_v6  ;;  %3534 = vmatprep.mubr.bf16.mxu0 %v1112_v6 }
 0x160   :  { %3487 = vmatmul.mubr.bf16.vlgmr.msra.gmra.mxu1 %v1113_v7  ;;  %3535 = vmatmul.mubr.bf16.vlgmr.msra.gmra.mxu0 %v1113_v7  ;;  %v4006_v11 = vpop.eup %4005 }
 0x161   :  { %3495 = vmatpush3.bf16.msra.mxu1 %v4812_v10  ;;  %3567 = vmatpush3.bf16.msra.mxu0 %v4812_v10 }
 0x162   :  { %3496 = vmatprep.subr.bf16.mxu1 %v4821_v13  ;;  %3568 = vmatprep.subr.bf16.mxu0 %v4821_v13  ;;  %v4008_v15 = vpop.eup %4007 }
 0x164   :  { %v4010_v16 = vpop.eup %4009 }
 0x165   :  { %v4012_v18 = vpop.eup %4011  ;;  %v1114_v20 = vpack.c.bf16 %v4010_v16, %v4006_v11  ;;  %3497 = vmatpush3.bf16.msra.mxu1 %v4821_v13  ;;  %3569 = vmatpush3.bf16.msra.mxu0 %v4821_v13 }
 0x166   :  { %v1115_v24 = vpack.c.bf16 %v4008_v15, %v4012_v18  ;;  %3498 = vmatprep.subr.bf16.mxu1 %v4832_v25  ;;  %3570 = vmatprep.subr.bf16.mxu0 %v4832_v25 }
 0x167   :  { %3490 = vmatprep.mubr.bf16.mxu1 %v1114_v20  ;;  %3538 = vmatprep.mubr.bf16.mxu0 %v1114_v20 }
 0x168   :  { %3491 = vmatmul.mubr.bf16.gmra.mxu1 %v1115_v24  ;;  %3539 = vmatmul.mubr.bf16.gmra.mxu0 %v1115_v24 }
 0x169   :  { %3499 = vmatpush3.bf16.msra.mxu1 %v4832_v25  ;;  %3571 = vmatpush3.bf16.msra.mxu0 %v4832_v25 }
 0x16a   :  { %3500 = vmatprep.subr.bf16.mxu1 %v4843_v9  ;;  %3572 = vmatprep.subr.bf16.mxu0 %v4843_v9 }
 0x16d   :  { %3501 = vmatpush3.bf16.msra.mxu1 %v4843_v9  ;;  %3573 = vmatpush3.bf16.msra.mxu0 %v4843_v9 }
 0x16e   :  { %3502 = vmatprep.subr.bf16.mxu1 %v4395_v19  ;;  %3574 = vmatprep.subr.bf16.mxu0 %v4395_v19  ;;  %v4866_v19 = vpop.f32.mrf.mxu0 }
 0x170   :  { %v4872_v42 = vpop.f32.mrf.mxu0 }
 0x171   :  { %3503 = vmatpush3.bf16.msra.mxu1 %v4856_v22  ;;  %3575 = vmatpush3.bf16.msra.mxu0 %v4856_v22 }
 0x172   :  { %3504 = vmatprep.subr.bf16.mxu1 %v4410_v23  ;;  %3576 = vmatprep.subr.bf16.mxu0 %v4410_v23 }
 0x175   :  { %3505 = vmatpush3.bf16.msra.mxu1 %v4410_v23  ;;  %3577 = vmatpush3.bf16.msra.mxu0 %v4410_v23  ;;  %v4878_v23 = vpop.f32.mrf.mxu0 }
 0x176   :  { %3506 = vmatprep.subr.bf16.mxu1 %v4425_v27  ;;  %3578 = vmatprep.subr.bf16.mxu0 %v4425_v27 }
 0x177   :  { %v4882_v26 = vpop.f32.mrf.mxu0 }
 0x179   :  { %3507 = vmatpush3.bf16.msra.mxu1 %v4425_v27  ;;  %3579 = vmatpush3.bf16.msra.mxu0 %v4425_v27  ;;  %v4884_v43 = vpop.f32.mrf.mxu0 }
 0x17a   :  { %3508 = vmatprep.subr.bf16.mxu1 %v4441_v31  ;;  %3580 = vmatprep.subr.bf16.mxu0 %v4441_v31 }
 0x17b   :  { %v4886_v27 = vpop.f32.mrf.mxu0 }
 0x17d   :  { %3509 = vmatpush3.bf16.msra.mxu1 %v4441_v31  ;;  %3581 = vmatpush3.bf16.msra.mxu0 %v4441_v31  ;;  %v4888_v44 = vpop.f32.mrf.mxu0 }
 0x17e   :  { %3542 = vmatprep.subr.bf16.mxu1 %v4658_v35  ;;  %3614 = vmatprep.subr.bf16.mxu0 %v4658_v35 }
 0x17f   :  { %v4890_v45 = vpop.f32.mrf.mxu0 }
 0x181   :  { %v4892_v46 = vpop.f32.mrf.mxu0 }
 0x183   :  { %v4894_v47 = vpop.f32.mrf.mxu0 }
 0x185   :  { %v4896_v31 = vpop.f32.mrf.mxu0 }
 0x187   :  { %v4898_v48 = vpop.f32.mrf.mxu0 }
 0x189   :  { %v4900_v49 = vpop.f32.mrf.mxu0 }
 0x18b   :  { %v4902_v50 = vpop.f32.mrf.mxu0 }
 0x18d   :  { %v4904_v51 = vpop.f32.mrf.mxu0 }
 0x18f   :  { %v4906_v52 = vpop.f32.mrf.mxu0 }
 0x191   :  { %v4908_v53 = vpop.f32.mrf.mxu0 }
 0x193   :  { %v4910_v54 = vpop.f32.mrf.mxu0 }
 0x195   :  { %v4912_v55 = vpop.f32.mrf.mxu0 }
 0x197   :  { %v4914_v56 = vpop.f32.mrf.mxu0 }
 0x198   :  { %5472 = vst [vmem:[#allocation6_spill] sm:$0xff] %v4914_v56 }
 0x199   :  { %v4916_v57 = vpop.f32.mrf.mxu0 }
 0x19a   :  { %5473 = vst [vmem:[#allocation7_spill] sm:$0xff] %v4916_v57 }
 0x19b   :  { %v4918_v58 = vpop.f32.mrf.mxu0 }
 0x19c   :  { %5474 = vst [vmem:[#allocation8_spill] sm:$0xff] %v4918_v58 }
 0x19d   :  { %v4920_v59 = vpop.f32.mrf.mxu0 }
 0x19e   :  { %5475 = vst [vmem:[#allocation9_spill] sm:$0xff] %v4920_v59 }
 0x19f   :  { %v4922_v60 = vpop.f32.mrf.mxu0 }
 0x1a0   :  { %5476 = vst [vmem:[#allocation10_spill] sm:$0xff] %v4922_v60 }
 0x1a1   :  { %v4924_v61 = vpop.f32.mrf.mxu0 }
 0x1a2   :  { %5477 = vst [vmem:[#allocation11_spill] sm:$0xff] %v4924_v61 }
 0x1a3   :  { %v4926_v62 = vpop.f32.mrf.mxu0 }
 0x1a4   :  { %5478 = vst [vmem:[#allocation12_spill] sm:$0xff] %v4926_v62 }
 0x1a5   :  { %v4928_v63 = vpop.f32.mrf.mxu0 }
 0x1a6   :  { %5479 = vst [vmem:[#allocation13_spill] sm:$0xff] %v4928_v63 }
 0x1a7   :  { %v4930_v0 = vpop.f32.mrf.mxu0 }
 0x1a8   :  { %5480 = vst [vmem:[#allocation14_spill] sm:$0xff] %v4930_v0 }
 0x1a9   :  { %v4932_v3 = vpop.f32.mrf.mxu0 }
 0x1aa   :  { %5481 = vst [vmem:[#allocation15_spill] sm:$0xff] %v4932_v3 }
 0x1ab   :  { %v4934_v4 = vpop.f32.mrf.mxu0 }
 0x1ac   :  { %5482 = vst [vmem:[#allocation16_spill] sm:$0xff] %v4934_v4 }
 0x1ad   :  { %v4936_v6 = vpop.f32.mrf.mxu0 }
 0x1ae   :  { %5483 = vst [vmem:[#allocation17_spill] sm:$0xff] %v4936_v6 }
 0x1af   :  { %v4938_v7 = vpop.f32.mrf.mxu0 }
 0x1b0   :  { %5484 = vst [vmem:[#allocation18_spill] sm:$0xff] %v4938_v7 }
 0x1b1   :  { %v4940_v11 = vpop.f32.mrf.mxu0 }
 0x1b2   :  { %5485 = vst [vmem:[#allocation19_spill] sm:$0xff] %v4940_v11 }
 0x1b3   :  { %v4942_v15 = vpop.f32.mrf.mxu0 }
 0x1b4   :  { %5486 = vst [vmem:[#allocation20_spill] sm:$0xff] %v4942_v15 }
 0x1b5   :  { %v4944_v16 = vpop.f32.mrf.mxu0 }
 0x1b6   :  { %5487 = vst [vmem:[#allocation21_spill] sm:$0xff] %v4944_v16 }
 0x1b7   :  { %v4946_v18 = vpop.f32.mrf.mxu0 }
 0x1b8   :  { %5488 = vst [vmem:[#allocation22_spill] sm:$0xff] %v4946_v18 }
 0x1b9   :  { %v4948_v20 = vpop.f32.mrf.mxu0 }
 0x1ba   :  { %5489 = vst [vmem:[#allocation23_spill] sm:$0xff] %v4948_v20 }
 0x1bb   :  { %v4950_v24 = vpop.f32.mrf.mxu0 }
 0x1bc   :  { %5490 = vst [vmem:[#allocation24_spill] sm:$0xff] %v4950_v24 }
 0x1bd   :  { %v4952_v0 = vpop.f32.mrf.mxu0 }
 0x1be   :  { %5491 = vst [vmem:[#allocation25_spill] sm:$0xff] %v4952_v0  ;;  %v4969_v0 = vld [vmem:[%s5468_s5] ss:$0 sm:$0xff] }
 0x1bf   :  { %v4954_v3 = vpop.f32.mrf.mxu0 }
 0x1c0   :  { %5492 = vst [vmem:[#allocation26_spill] sm:$0xff] %v4954_v3 }
 0x1c1   :  { %v4956_v4 = vpop.f32.mrf.mxu0 }
 0x1c2   :  { %5493 = vst [vmem:[#allocation27_spill] sm:$0xff] %v4956_v4 }
 0x1c3   :  { %v4958_v6 = vpop.f32.mrf.mxu0 }
 0x1c4   :  { %5494 = vst [vmem:[#allocation28_spill] sm:$0xff] %v4958_v6 }
 0x1c5   :  { %v4960_v7 = vpop.f32.mrf.mxu0 }
 0x1c6   :  { %5495 = vst [vmem:[#allocation29_spill] sm:$0xff] %v4960_v7 }
 0x220   :  { %v3488_v11 = vpop.f32.mrf.mxu1  ;;  %v4962_v15 = vpop.f32.mrf.mxu0 }
 0x221   :  { %v1223_v20 = vadd.f32 %v3488_v11, %v4793_v30 }
 0x222   :  { %v1214_v16 = vpop.f32.mrf.mxu1  ;;  %v1380_v60 = vpop.f32.mrf.mxu0 }
 0x223   :  { %v1215_v18 = vadd.f32 %v1214_v16, %v4795_v32  ;;  %v1254_v32 = vadd.f32 %v4969_v0, %v1223_v20 }
 0x224   :  { %v3489_v3 = vpop.f32.mrf.mxu1  ;;  %v3537_v7 = vpop.f32.mrf.mxu0 }
 0x225   :  { %v1252_v4 = vadd.f32 %v4969_v0, %v1215_v18  ;;  %v1226_v6 = vadd.f32 %v3489_v3, %v4797_v33 }
 0x226   :  { %v1217_v24 = vpop.f32.mrf.mxu1  ;;  %v1383_v11 = vpop.f32.mrf.mxu0 }
 0x227   :  { %v1255_v63 = vadd.f32 %v4969_v0, %v1226_v6  ;;  %v1218_v62 = vadd.f32 %v1217_v24, %v4799_v34  ;;  %4013 = vtanh.f32 %v1252_v4  ;;  %v1412_v33 = vadd.f32 %v1383_v11, %v4849_v29 }
 0x228   :  { %v3492_v16 = vpop.f32.mrf.mxu1 }
 0x229   :  { %v1253_v30 = vadd.f32 %v4969_v0, %v1218_v62  ;;  %4015 = vtanh.f32 %v1255_v63  ;;  %v1239_v3 = vadd.f32 %v3492_v16, %v4801_v36 }
 0x22a   :  { %v1230_v61 = vpop.f32.mrf.mxu1 }
 0x22b   :  { %4017 = vtanh.f32 %v1253_v30  ;;  %v1231_v18 = vadd.f32 %v1230_v61, %v4803_v37  ;;  %v1258_v63 = vadd.f32 %v4969_v0, %v1239_v3  ;;  %v1411_v37 = vadd.f32 %v1380_v60, %v4827_v21 }
 0x22c   :  { %4019 = vtanh.f32 %v1254_v32  ;;  %v3493_v6 = vpop.f32.mrf.mxu1  ;;  %v3540_v32 = vpop.f32.mrf.mxu0 }
 0x22d   :  { %v1256_v34 = vadd.f32 %v4969_v0, %v1231_v18  ;;  %v1242_v20 = vadd.f32 %v3493_v6, %v4805_v39  ;;  %4021 = vtanh.f32 %v1412_v33 }
 0x22e   :  { %v1233_v24 = vpop.f32.mrf.mxu1 }
 0x22f   :  { %v1259_v4 = vadd.f32 %v4969_v0, %v1242_v20  ;;  %v1234_v62 = vadd.f32 %v1233_v24, %v4807_v40  ;;  %4023 = vtanh.f32 %v1256_v34  ;;  %v1396_v40 = vpop.f32.mrf.mxu0 }
 0x231   :  { %v1257_v29 = vadd.f32 %v4969_v0, %v1234_v62  ;;  %4025 = vtanh.f32 %v1259_v4  ;;  %v3541_v3 = vpop.f32.mrf.mxu0 }
 0x233   :  { %4027 = vtanh.f32 %v1257_v29  ;;  %v1399_v62 = vpop.f32.mrf.mxu0  ;;  %v1413_v29 = vadd.f32 %v4962_v15, %v4816_v12 }
 0x234   :  { %4029 = vtanh.f32 %v1258_v63  ;;  %v4014_v36 = vpop.eup %4013  ;;  %v1414_v63 = vadd.f32 %v3537_v7, %v4838_v28  ;;  %v1418_v28 = vadd.f32 %v3541_v3, %v4872_v42  ;;  %v5078_v3 = vld [vmem:[%s5467_s4 + $0x10] sm:$0xff]  }
 0x235   :  { %4031 = vtanh.f32 %v1411_v37  ;;  %v1416_v37 = vadd.f32 %v1399_v62, %v4878_v23  ;;  %v1417_v23 = vadd.f32 %v3540_v32, %v4860_v41  ;;  %v5012_v41 = vld [vmem:[%s5465_s2 + $0x38] sm:$0xff]  }
 0x236   :  { %v4016_v61 = vpop.eup %4015  ;;  %4033 = vtanh.f32 %v1414_v63 }
 0x237   :  { %4035 = vtanh.f32 %v1416_v37 }
 0x238   :  { %v4018_v39 = vpop.eup %4017  ;;  %4037 = vtanh.f32 %v1413_v29 }
 0x239   :  { %v4020_v16 = vpop.eup %4019  ;;  %v1268_v30 = vpack.c.bf16 %v4018_v39, %v4014_v36  ;;  %v1415_v36 = vadd.f32 %v1396_v40, %v4866_v19  ;;  %v5019_v39 = vld [vmem:[%s5465_s2 + $0x30] sm:$0xff]   ;;  %v5033_v40 = vld [vmem:[%s5465_s2 + $0x20] sm:$0xff]  }
 0x23a   :  { %v1269_v11 = vpack.c.bf16 %v4016_v61, %v4020_v16  ;;  %v4022_v18 = vpop.eup %4021 }
 0x23b   :  { %3510 = vmatprep.mubr.bf16.mxu1 %v1268_v30  ;;  %4039 = vtanh.f32 %v1415_v36 }
 0x23c   :  { %3511 = vmatmul.mubr.bf16.vlgmr.msra.gmra.mxu1 %v1269_v11  ;;  %v4024_v21 = vpop.eup %4023  ;;  %4041 = vtanh.f32 %v1418_v28  ;;  %v5026_v11 = vld [vmem:[%s5465_s2 + $0x28] sm:$0xff]  }
 0x23d   :  { %3543 = vmatpush3.bf16.msra.mxu1 %v4658_v35  ;;  %4043 = vtanh.f32 %v1417_v23 }
 0x23e   :  { %3544 = vmatprep.subr.bf16.mxu1 %v4670_v38  ;;  %v4026_v60 = vpop.eup %4025 }
 0x240   :  { %v4028_v33 = vpop.eup %4027 }
 0x241   :  { %v4030_v6 = vpop.eup %4029  ;;  %3545 = vmatpush3.bf16.msra.mxu1 %v4670_v38  ;;  %v1270_v34 = vpack.c.bf16 %v4028_v33, %v4024_v21  ;;  %v5047_v21 = vld [vmem:[%s5465_s2 + $0x10] sm:$0xff]   ;;  %v5061_v33 = vld [vmem:[%s5465_s2] sm:$0xff]  }
 0x242   :  { %v4032_v20 = vpop.eup %4031  ;;  %3546 = vmatprep.subr.bf16.mxu1 %v4725_v1  ;;  %v1271_v24 = vpack.c.bf16 %v4026_v60, %v4030_v6  ;;  %v5054_v60 = vld [vmem:[%s5465_s2 + $0x8] sm:$0xff]  }
 0x243   :  { %3514 = vmatprep.mubr.bf16.mxu1 %v1270_v34  ;;  %v1427_v4 = vpack.c.bf16 %v4022_v18, %v4032_v20  ;;  %v4034_v12 = vpop.eup %4033  ;;  %v5040_v18 = vld [vmem:[%s5465_s2 + $0x18] sm:$0xff]   ;;  %v5085_v6 = vld [vmem:[%s5467_s4 + $0x8] sm:$0xff]   ;;  %v5092_v34 = vld [vmem:[%s5467_s4] sm:$0xff]  }
 0x244   :  { %3515 = vmatmul.mubr.bf16.gmra.mxu1 %v1271_v24  ;;  %v4036_v19 = vpop.eup %4035 }
 0x245   :  { %3547 = vmatpush3.bf16.msra.mxu1 %v4725_v1  ;;  %3558 = vmatprep.mubr.bf16.mxu1 %v1427_v4  ;;  %v4038_v7 = vpop.eup %4037 }
 0x246   :  { %3548 = vmatprep.subr.bf16.mxu1 %v4735_v5  ;;  %v1428_v15 = vpack.c.bf16 %v4034_v12, %v4038_v7 }
 0x248   :  { %v4040_v42 = vpop.eup %4039 }
 0x249   :  { %3549 = vmatpush3.bf16.msra.mxu1 %v4735_v5  ;;  %v1429_v61 = vpack.c.bf16 %v4036_v19, %v4040_v42  ;;  %v4042_v32 = vpop.eup %4041 }
 0x24a   :  { %3550 = vmatprep.subr.bf16.mxu1 %v4745_v8  ;;  %v4044_v16 = vpop.eup %4043 }
 0x24b   :  { %v1430_v30 = vpack.c.bf16 %v4042_v32, %v4044_v16 }
 0x24d   :  { %3551 = vmatpush3.bf16.msra.mxu1 %v4745_v8 }
 0x24e   :  { %3552 = vmatprep.subr.bf16.mxu1 %v4755_v2 }
 0x251   :  { %3553 = vmatpush3.bf16.msra.mxu1 %v4755_v2 }
 0x252   :  { %3554 = vmatprep.subr.bf16.mxu1 %v4765_v14 }
 0x255   :  { %3555 = vmatpush3.bf16.msra.mxu1 %v4765_v14 }
 0x256   :  { %3556 = vmatprep.subr.bf16.mxu1 %v4775_v17 }
 0x259   :  { %3557 = vmatpush3.bf16.msra.mxu1 %v4775_v17 }
 0x25a   :  { %3590 = vmatprep.subr.bf16.mxu1 %v5012_v41 }
 0x25c   :  { %3559 = vmatmul.mubr.bf16.vlgmr.msra.gmra.mxu1 %v1428_v15 }
 0x25d   :  { %3562 = vmatprep.mubr.bf16.mxu1 %v1429_v61  ;;  %3591 = vmatpush3.bf16.msra.mxu1 %v5012_v41 }
 0x25e   :  { %3592 = vmatprep.subr.bf16.mxu1 %v5019_v39 }
 0x261   :  { %3593 = vmatpush3.bf16.msra.mxu1 %v5019_v39 }
 0x262   :  { %3594 = vmatprep.subr.bf16.mxu1 %v5026_v11 }
 0x264   :  { %3563 = vmatmul.mubr.bf16.gmra.mxu1 %v1430_v30 }
 0x265   :  { %3595 = vmatpush3.bf16.msra.mxu1 %v5026_v11  ;;  %3606 = vmatprep.mubr.bf16.mxu1 %v1427_v4 }
 0x266   :  { %3596 = vmatprep.subr.bf16.mxu1 %v5033_v40 }
 0x269   :  { %3597 = vmatpush3.bf16.msra.mxu1 %v5033_v40 }
 0x26a   :  { %3598 = vmatprep.subr.bf16.mxu1 %v5040_v18 }
 0x26d   :  { %3599 = vmatpush3.bf16.msra.mxu1 %v5040_v18 }
 0x26e   :  { %3600 = vmatprep.subr.bf16.mxu1 %v5047_v21 }
 0x271   :  { %3601 = vmatpush3.bf16.msra.mxu1 %v5047_v21 }
 0x272   :  { %3602 = vmatprep.subr.bf16.mxu1 %v5054_v60 }
 0x275   :  { %3603 = vmatpush3.bf16.msra.mxu1 %v5054_v60 }
 0x276   :  { %3604 = vmatprep.subr.bf16.mxu1 %v5061_v33 }
 0x279   :  { %3605 = vmatpush3.bf16.msra.mxu1 %v5061_v33 }
 0x27a   :  { %3638 = vmatprep.subr.bf16.mxu1 %v4812_v10 }
 0x27c   :  { %3607 = vmatmul.mubr.bf16.vlgmr.msra.gmra.mxu1 %v1428_v15 }
 0x27d   :  { %3610 = vmatprep.mubr.bf16.mxu1 %v1429_v61  ;;  %3639 = vmatpush3.bf16.msra.mxu1 %v4812_v10 }
 0x27e   :  { %3640 = vmatprep.subr.bf16.mxu1 %v4821_v13 }
 0x281   :  { %3641 = vmatpush3.bf16.msra.mxu1 %v4821_v13 }
 0x282   :  { %3642 = vmatprep.subr.bf16.mxu1 %v4832_v25 }
 0x284   :  { %3611 = vmatmul.mubr.bf16.gmra.mxu1 %v1430_v30 }
 0x285   :  { %3643 = vmatpush3.bf16.msra.mxu1 %v4832_v25 }
 0x286   :  { %3644 = vmatprep.subr.bf16.mxu1 %v4843_v9 }
 0x289   :  { %3645 = vmatpush3.bf16.msra.mxu1 %v4843_v9 }
 0x28a   :  { %3646 = vmatprep.subr.bf16.mxu1 %v4856_v22 }
 0x28d   :  { %3647 = vmatpush3.bf16.msra.mxu1 %v4856_v22 }
 0x28e   :  { %3648 = vmatprep.subr.bf16.mxu1 %v5078_v3 }
 0x291   :  { %3649 = vmatpush3.bf16.msra.mxu1 %v5078_v3 }
 0x292   :  { %3650 = vmatprep.subr.bf16.mxu1 %v5085_v6 }
 0x295   :  { %3651 = vmatpush3.bf16.msra.mxu1 %v5085_v6 }
 0x296   :  { %3652 = vmatprep.subr.bf16.mxu1 %v5092_v34 }
 0x299   :  { %3653 = vmatpush3.bf16.msra.mxu1 %v5092_v34 }
 0x29a   :  { %3686 = vmatprep.subr.bf16.mxu1 %v4658_v35 }
 0x2fc   :  { %v3512_v20 = vpop.f32.mrf.mxu1 }
 0x2fe   :  { %v1315_v24 = vpop.f32.mrf.mxu1 }
 0x300   :  { %v3513_v4 = vpop.f32.mrf.mxu1 }
 0x302   :  { %v1318_v62 = vpop.f32.mrf.mxu1 }
 0x304   :  { %v3516_v63 = vpop.f32.mrf.mxu1 }
 0x306   :  { %v1331_v37 = vpop.f32.mrf.mxu1 }
 0x308   :  { %v3517_v29 = vpop.f32.mrf.mxu1 }
 0x30a   :  { %v1334_v36 = vpop.f32.mrf.mxu1 }
 0x31c   :  { %v3560_v28 = vpop.f32.mrf.mxu1 }
 0x31d   :  { %v1474_v19 = vadd.f32 %v3560_v28, %v3512_v20 }
 0x31e   :  { %v1465_v23 = vpop.f32.mrf.mxu1 }
 0x31f   :  { %v1466_v12 = vadd.f32 %v1465_v23, %v1315_v24  ;;  %v1498_v30 = vadd.f32 %v4969_v0, %v1474_v19 }
 0x320   :  { %v3561_v7 = vpop.f32.mrf.mxu1 }
 0x321   :  { %v1496_v42 = vadd.f32 %v4969_v0, %v1466_v12  ;;  %v1477_v15 = vadd.f32 %v3561_v7, %v3513_v4 }
 0x322   :  { %v1468_v61 = vpop.f32.mrf.mxu1 }
 0x323   :  { %v1499_v32 = vadd.f32 %v4969_v0, %v1477_v15  ;;  %v1469_v16 = vadd.f32 %v1468_v61, %v1318_v62  ;;  %4045 = vtanh.f32 %v1496_v42 }
 0x324   :  { %v3564_v56 = vpop.f32.mrf.mxu1 }
 0x325   :  { %v1497_v59 = vadd.f32 %v4969_v0, %v1469_v16  ;;  %4047 = vtanh.f32 %v1499_v32  ;;  %v1490_v20 = vadd.f32 %v3564_v56, %v3516_v63 }
 0x326   :  { %v1481_v58 = vpop.f32.mrf.mxu1 }
 0x327   :  { %4049 = vtanh.f32 %v1497_v59  ;;  %v1482_v57 = vadd.f32 %v1481_v58, %v1331_v37  ;;  %v1502_v19 = vadd.f32 %v4969_v0, %v1490_v20 }
 0x328   :  { %4051 = vtanh.f32 %v1498_v30  ;;  %v3565_v24 = vpop.f32.mrf.mxu1 }
 0x329   :  { %v1500_v28 = vadd.f32 %v4969_v0, %v1482_v57  ;;  %v1493_v4 = vadd.f32 %v3565_v24, %v3517_v29 }
 0x32a   :  { %v1484_v23 = vpop.f32.mrf.mxu1 }
 0x32b   :  { %v1503_v12 = vadd.f32 %v4969_v0, %v1493_v4  ;;  %v1485_v62 = vadd.f32 %v1484_v23, %v1334_v36  ;;  %4053 = vtanh.f32 %v1500_v28 }
 0x32d   :  { %v1501_v7 = vadd.f32 %v4969_v0, %v1485_v62  ;;  %4055 = vtanh.f32 %v1503_v12 }
 0x32f   :  { %4057 = vtanh.f32 %v1501_v7 }
 0x330   :  { %4059 = vtanh.f32 %v1502_v19  ;;  %v4046_v59 = vpop.eup %4045 }
 0x332   :  { %v4048_v58 = vpop.eup %4047 }
 0x334   :  { %v4050_v37 = vpop.eup %4049 }
 0x335   :  { %v4052_v56 = vpop.eup %4051  ;;  %v1512_v63 = vpack.c.bf16 %v4050_v37, %v4046_v59 }
 0x336   :  { %v1513_v42 = vpack.c.bf16 %v4048_v58, %v4052_v56 }
 0x337   :  { %3582 = vmatprep.mubr.bf16.mxu0 %v1512_v63 }
 0x338   :  { %3583 = vmatmul.mubr.bf16.vlgmr.msra.gmra.mxu0 %v1513_v42  ;;  %v4054_v57 = vpop.eup %4053 }
 0x339   :  { %3615 = vmatpush3.bf16.msra.mxu0 %v4658_v35 }
 0x33a   :  { %3616 = vmatprep.subr.bf16.mxu0 %v4670_v38  ;;  %v4056_v29 = vpop.eup %4055 }
 0x33c   :  { %v4058_v36 = vpop.eup %4057  ;;  %v3608_v15 = vpop.f32.mrf.mxu1 }
 0x33d   :  { %v4060_v61 = vpop.eup %4059  ;;  %3617 = vmatpush3.bf16.msra.mxu0 %v4670_v38  ;;  %v1514_v32 = vpack.c.bf16 %v4058_v36, %v4054_v57  ;;  %v1657_v38 = vadd.f32 %v3608_v15, %v4882_v26 }
 0x33e   :  { %v1624_v16 = vpop.f32.mrf.mxu1  ;;  %3618 = vmatprep.subr.bf16.mxu0 %v4725_v1  ;;  %v1515_v30 = vpack.c.bf16 %v4056_v29, %v4060_v61 }
 0x33f   :  { %3586 = vmatprep.mubr.bf16.mxu0 %v1514_v32  ;;  %v1655_v20 = vadd.f32 %v1624_v16, %v4884_v43 }
 0x340   :  { %3587 = vmatmul.mubr.bf16.gmra.mxu0 %v1515_v30  ;;  %v3609_v24 = vpop.f32.mrf.mxu1 }
 0x341   :  { %3619 = vmatpush3.bf16.msra.mxu0 %v4725_v1  ;;  %v1658_v35 = vadd.f32 %v3609_v24, %v4886_v27  ;;  %4061 = vtanh.f32 %v1655_v20 }
 0x342   :  { %v1627_v28 = vpop.f32.mrf.mxu1  ;;  %3620 = vmatprep.subr.bf16.mxu0 %v4735_v5 }
 0x343   :  { %v1656_v4 = vadd.f32 %v1627_v28, %v4888_v44 }
 0x344   :  { %v3612_v23 = vpop.f32.mrf.mxu1 }
 0x345   :  { %4063 = vtanh.f32 %v1656_v4  ;;  %3621 = vmatpush3.bf16.msra.mxu0 %v4735_v5  ;;  %v1661_v62 = vadd.f32 %v3612_v23, %v4890_v45 }
 0x346   :  { %4065 = vtanh.f32 %v1658_v35  ;;  %v1640_v43 = vpop.f32.mrf.mxu1  ;;  %3622 = vmatprep.subr.bf16.mxu0 %v4745_v8 }
 0x347   :  { %4067 = vtanh.f32 %v1657_v38  ;;  %v1659_v1 = vadd.f32 %v1640_v43, %v4892_v46 }
 0x348   :  { %v3613_v27 = vpop.f32.mrf.mxu1 }
 0x349   :  { %3623 = vmatpush3.bf16.msra.mxu0 %v4745_v8  ;;  %v1662_v12 = vadd.f32 %v3613_v27, %v4894_v47  ;;  %4069 = vtanh.f32 %v1659_v1 }
 0x34a   :  { %v1643_v44 = vpop.f32.mrf.mxu1  ;;  %3624 = vmatprep.subr.bf16.mxu0 %v4755_v2 }
 0x34b   :  { %v1660_v26 = vadd.f32 %v1643_v44, %v4896_v31 }
 0x34d   :  { %4071 = vtanh.f32 %v1660_v26  ;;  %3625 = vmatpush3.bf16.msra.mxu0 %v4755_v2 }
 0x34e   :  { %4073 = vtanh.f32 %v1662_v12  ;;  %3626 = vmatprep.subr.bf16.mxu0 %v4765_v14  ;;  %v4062_v5 = vpop.eup %4061 }
 0x34f   :  { %4075 = vtanh.f32 %v1661_v62 }
 0x351   :  { %3627 = vmatpush3.bf16.msra.mxu0 %v4765_v14 }
 0x352   :  { %v4064_v8 = vpop.eup %4063  ;;  %3628 = vmatprep.subr.bf16.mxu0 %v4775_v17 }
 0x353   :  { %v4066_v46 = vpop.eup %4065  ;;  %v1671_v47 = vpack.c.bf16 %v4064_v8, %v4062_v5 }
 0x354   :  { %v4068_v19 = vpop.eup %4067 }
 0x355   :  { %3629 = vmatpush3.bf16.msra.mxu0 %v4775_v17  ;;  %3630 = vmatprep.mubr.bf16.mxu0 %v1671_v47  ;;  %v1672_v45 = vpack.c.bf16 %v4066_v46, %v4068_v19  ;;  %v5163_v17 = vld [vmem:[%s5466_s3 + $0x38] sm:$0xff]  }
 0x356   :  { %3662 = vmatprep.subr.bf16.mxu0 %v5012_v41  ;;  %v4070_v2 = vpop.eup %4069 }
 0x358   :  { %3631 = vmatmul.mubr.bf16.vlgmr.msra.gmra.mxu0 %v1672_v45 }
 0x359   :  { %3663 = vmatpush3.bf16.msra.mxu0 %v5012_v41 }
 0x35a   :  { %v4072_v31 = vpop.eup %4071  ;;  %3664 = vmatprep.subr.bf16.mxu0 %v5019_v39 }
 0x35b   :  { %v4074_v14 = vpop.eup %4073  ;;  %v1673_v7 = vpack.c.bf16 %v4072_v31, %v4070_v2 }
 0x35c   :  { %v4076_v59 = vpop.eup %4075 }
 0x35d   :  { %3665 = vmatpush3.bf16.msra.mxu0 %v5019_v39  ;;  %3634 = vmatprep.mubr.bf16.mxu0 %v1673_v7  ;;  %v1674_v58 = vpack.c.bf16 %v4074_v14, %v4076_v59 }
 0x35e   :  { %3666 = vmatprep.subr.bf16.mxu0 %v5026_v11 }
 0x360   :  { %3635 = vmatmul.mubr.bf16.gmra.mxu0 %v1674_v58 }
 0x361   :  { %3667 = vmatpush3.bf16.msra.mxu0 %v5026_v11  ;;  %3678 = vmatprep.mubr.bf16.mxu0 %v1671_v47 }
 0x362   :  { %3668 = vmatprep.subr.bf16.mxu0 %v5033_v40 }
 0x365   :  { %3669 = vmatpush3.bf16.msra.mxu0 %v5033_v40 }
 0x366   :  { %3670 = vmatprep.subr.bf16.mxu0 %v5040_v18 }
 0x369   :  { %3671 = vmatpush3.bf16.msra.mxu0 %v5040_v18 }
 0x36a   :  { %3672 = vmatprep.subr.bf16.mxu0 %v5047_v21 }
 0x36d   :  { %3673 = vmatpush3.bf16.msra.mxu0 %v5047_v21 }
 0x36e   :  { %3674 = vmatprep.subr.bf16.mxu0 %v5054_v60 }
 0x371   :  { %3675 = vmatpush3.bf16.msra.mxu0 %v5054_v60 }
 0x372   :  { %3676 = vmatprep.subr.bf16.mxu0 %v5061_v33 }
 0x375   :  { %3677 = vmatpush3.bf16.msra.mxu0 %v5061_v33 }
 0x376   :  { %3710 = vmatprep.subr.bf16.mxu0 %v4812_v10 }
 0x378   :  { %3679 = vmatmul.mubr.bf16.vlgmr.msra.gmra.mxu0 %v1672_v45 }
 0x379   :  { %3682 = vmatprep.mubr.bf16.mxu0 %v1673_v7  ;;  %3711 = vmatpush3.bf16.msra.mxu0 %v4812_v10 }
 0x37a   :  { %3712 = vmatprep.subr.bf16.mxu0 %v4821_v13 }
 0x37d   :  { %3713 = vmatpush3.bf16.msra.mxu0 %v4821_v13 }
 0x37e   :  { %3714 = vmatprep.subr.bf16.mxu0 %v4832_v25 }
 0x380   :  { %3683 = vmatmul.mubr.bf16.gmra.mxu0 %v1674_v58 }
 0x381   :  { %3715 = vmatpush3.bf16.msra.mxu0 %v4832_v25 }
 0x382   :  { %3716 = vmatprep.subr.bf16.mxu0 %v4843_v9 }
 0x385   :  { %3717 = vmatpush3.bf16.msra.mxu0 %v4843_v9 }
 0x386   :  { %3718 = vmatprep.subr.bf16.mxu0 %v4856_v22 }
 0x389   :  { %3719 = vmatpush3.bf16.msra.mxu0 %v4856_v22 }
 0x38a   :  { %3720 = vmatprep.subr.bf16.mxu0 %v5078_v3 }
 0x38d   :  { %3721 = vmatpush3.bf16.msra.mxu0 %v5078_v3 }
 0x38e   :  { %3722 = vmatprep.subr.bf16.mxu0 %v5085_v6 }
 0x391   :  { %3723 = vmatpush3.bf16.msra.mxu0 %v5085_v6 }
 0x392   :  { %3724 = vmatprep.subr.bf16.mxu0 %v5092_v34 }
 0x395   :  { %3725 = vmatpush3.bf16.msra.mxu0 %v5092_v34 }
 0x396   :  { %3758 = vmatprep.subr.bf16.mxu0 %v5163_v17 }
 0x3f8   :  { %v3584_v37 = vpop.f32.mrf.mxu0 }
 0x3fa   :  { %v1559_v56 = vpop.f32.mrf.mxu0 }
 0x3fc   :  { %v3585_v63 = vpop.f32.mrf.mxu0 }
 0x3fe   :  { %v1562_v42 = vpop.f32.mrf.mxu0 }
 0x400   :  { %v3588_v57 = vpop.f32.mrf.mxu0 }
 0x402   :  { %v1575_v29 = vpop.f32.mrf.mxu0 }
 0x404   :  { %v3589_v36 = vpop.f32.mrf.mxu0 }
 0x406   :  { %v1578_v15 = vpop.f32.mrf.mxu0 }
 0x418   :  { %v3632_v61 = vpop.f32.mrf.mxu0 }
 0x419   :  { %v1718_v30 = vadd.f32 %v3632_v61, %v3584_v37  ;;  %v5185_v61 = vld [vmem:[%s5466_s3 + $0x28] sm:$0xff]  }
 0x41a   :  { %v1709_v32 = vpop.f32.mrf.mxu0 }
 0x41b   :  { %v1710_v16 = vadd.f32 %v1709_v32, %v1559_v56  ;;  %v1742_v23 = vadd.f32 %v4969_v0, %v1718_v30  ;;  %v5178_v56 = vld [vmem:[%s5466_s3 + $0x30] sm:$0xff]  }
 0x41c   :  { %v3633_v20 = vpop.f32.mrf.mxu0 }
 0x41d   :  { %v1740_v24 = vadd.f32 %v4969_v0, %v1710_v16  ;;  %v1721_v35 = vadd.f32 %v3633_v20, %v3585_v63 }
 0x41e   :  { %v1712_v28 = vpop.f32.mrf.mxu0 }
 0x41f   :  { %v1743_v4 = vadd.f32 %v4969_v0, %v1721_v35  ;;  %v1713_v38 = vadd.f32 %v1712_v28, %v1562_v42  ;;  %4077 = vtanh.f32 %v1740_v24  ;;  %v5194_v35 = vld [vmem:[%s5466_s3 + $0x20] sm:$0xff]  }
 0x420   :  { %v3636_v43 = vpop.f32.mrf.mxu0 }
 0x421   :  { %v1741_v1 = vadd.f32 %v4969_v0, %v1713_v38  ;;  %4079 = vtanh.f32 %v1743_v4  ;;  %v1734_v44 = vadd.f32 %v3636_v43, %v3588_v57 }
 0x422   :  { %v1725_v27 = vpop.f32.mrf.mxu0 }
 0x423   :  { %4081 = vtanh.f32 %v1741_v1  ;;  %v1726_v12 = vadd.f32 %v1725_v27, %v1575_v29  ;;  %v1746_v19 = vadd.f32 %v4969_v0, %v1734_v44  ;;  %v5212_v1 = vld [vmem:[%s5466_s3 + $0x10] sm:$0xff]  }
 0x424   :  { %4083 = vtanh.f32 %v1742_v23  ;;  %v3637_v26 = vpop.f32.mrf.mxu0 }
 0x425   :  { %v1744_v62 = vadd.f32 %v4969_v0, %v1726_v12  ;;  %v1737_v5 = vadd.f32 %v3637_v26, %v3589_v36 }
 0x426   :  { %v1728_v8 = vpop.f32.mrf.mxu0 }
 0x427   :  { %v1747_v46 = vadd.f32 %v4969_v0, %v1737_v5  ;;  %v1729_v47 = vadd.f32 %v1728_v8, %v1578_v15  ;;  %4085 = vtanh.f32 %v1744_v62 }
 0x429   :  { %v1745_v45 = vadd.f32 %v4969_v0, %v1729_v47  ;;  %4087 = vtanh.f32 %v1747_v46 }
 0x42b   :  { %4089 = vtanh.f32 %v1745_v45 }
 0x42c   :  { %4091 = vtanh.f32 %v1746_v19  ;;  %v4078_v2 = vpop.eup %4077 }
 0x42e   :  { %v4080_v31 = vpop.eup %4079 }
 0x430   :  { %v4082_v14 = vpop.eup %4081 }
 0x431   :  { %v4084_v7 = vpop.eup %4083  ;;  %v1756_v59 = vpack.c.bf16 %v4082_v14, %v4078_v2 }
 0x432   :  { %v1757_v58 = vpack.c.bf16 %v4080_v31, %v4084_v7 }
 0x433   :  { %3654 = vmatprep.mubr.bf16.mxu1 %v1756_v59 }
 0x434   :  { %3655 = vmatmul.mubr.bf16.vlgmr.msra.gmra.mxu1 %v1757_v58  ;;  %v4086_v37 = vpop.eup %4085 }
 0x435   :  { %3687 = vmatpush3.bf16.msra.mxu1 %v5163_v17 }
 0x436   :  { %3688 = vmatprep.subr.bf16.mxu1 %v5178_v56  ;;  %v4088_v63 = vpop.eup %4087 }
 0x438   :  { %v4090_v42 = vpop.eup %4089  ;;  %v3680_v57 = vpop.f32.mrf.mxu0 }
 0x439   :  { %v4092_v29 = vpop.eup %4091  ;;  %3689 = vmatpush3.bf16.msra.mxu1 %v5178_v56  ;;  %v1758_v36 = vpack.c.bf16 %v4090_v42, %v4086_v37  ;;  %v1901_v4 = vadd.f32 %v3680_v57, %v4898_v48 }
 0x43a   :  { %v1868_v15 = vpop.f32.mrf.mxu0  ;;  %3690 = vmatprep.subr.bf16.mxu1 %v5185_v61  ;;  %v1759_v32 = vpack.c.bf16 %v4088_v63, %v4092_v29 }
 0x43b   :  { %3658 = vmatprep.mubr.bf16.mxu1 %v1758_v36  ;;  %v1899_v16 = vadd.f32 %v1868_v15, %v4900_v49 }
 0x43c   :  { %3659 = vmatmul.mubr.bf16.gmra.mxu1 %v1759_v32  ;;  %v3681_v30 = vpop.f32.mrf.mxu0 }
 0x43d   :  { %3691 = vmatpush3.bf16.msra.mxu1 %v5185_v61  ;;  %v1902_v20 = vadd.f32 %v3681_v30, %v4902_v50  ;;  %4093 = vtanh.f32 %v1899_v16  ;;  %v5203_v50 = vld [vmem:[%s5466_s3 + $0x18] sm:$0xff]  }
 0x43e   :  { %v1871_v24 = vpop.f32.mrf.mxu0  ;;  %3692 = vmatprep.subr.bf16.mxu1 %v5194_v35 }
 0x43f   :  { %v1900_v28 = vadd.f32 %v1871_v24, %v4904_v51 }
 0x440   :  { %v3684_v49 = vpop.f32.mrf.mxu0 }
 0x441   :  { %4095 = vtanh.f32 %v1900_v28  ;;  %3693 = vmatpush3.bf16.msra.mxu1 %v5194_v35  ;;  %v1905_v12 = vadd.f32 %v3684_v49, %v4906_v52  ;;  %v5228_v52 = vld [vmem:[%s5466_s3] sm:$0xff]  }
 0x442   :  { %4097 = vtanh.f32 %v1902_v20  ;;  %v1884_v38 = vpop.f32.mrf.mxu0  ;;  %3694 = vmatprep.subr.bf16.mxu1 %v5203_v50 }
 0x443   :  { %4099 = vtanh.f32 %v1901_v4  ;;  %v1903_v23 = vadd.f32 %v1884_v38, %v4908_v53  ;;  %v5221_v53 = vld [vmem:[%s5466_s3 + $0x8] sm:$0xff]  }
 0x444   :  { %v3685_v51 = vpop.f32.mrf.mxu0 }
 0x445   :  { %3695 = vmatpush3.bf16.msra.mxu1 %v5203_v50  ;;  %v1906_v48 = vadd.f32 %v3685_v51, %v4910_v54  ;;  %4101 = vtanh.f32 %v1903_v23 }
 0x446   :  { %v1887_v43 = vpop.f32.mrf.mxu0  ;;  %3696 = vmatprep.subr.bf16.mxu1 %v5212_v1 }
 0x447   :  { %v1904_v27 = vadd.f32 %v1887_v43, %v4912_v55 }
 0x449   :  { %4103 = vtanh.f32 %v1904_v27  ;;  %3697 = vmatpush3.bf16.msra.mxu1 %v5212_v1 }
 0x44a   :  { %4105 = vtanh.f32 %v1906_v48  ;;  %3698 = vmatprep.subr.bf16.mxu1 %v5221_v53  ;;  %v4094_v54 = vpop.eup %4093 }
 0x44b   :  { %4107 = vtanh.f32 %v1905_v12 }
 0x44d   :  { %3699 = vmatpush3.bf16.msra.mxu1 %v5221_v53 }
 0x44e   :  { %v4096_v44 = vpop.eup %4095  ;;  %3700 = vmatprep.subr.bf16.mxu1 %v5228_v52 }
 0x44f   :  { %v4098_v55 = vpop.eup %4097  ;;  %v1915_v26 = vpack.c.bf16 %v4096_v44, %v4094_v54 }
 0x450   :  { %v4100_v62 = vpop.eup %4099 }
 0x451   :  { %3701 = vmatpush3.bf16.msra.mxu1 %v5228_v52  ;;  %3702 = vmatprep.mubr.bf16.mxu1 %v1915_v26  ;;  %v1916_v5 = vpack.c.bf16 %v4098_v55, %v4100_v62 }
 0x452   :  { %3734 = vmatprep.subr.bf16.mxu1 %v5012_v41  ;;  %v4102_v8 = vpop.eup %4101 }
 0x454   :  { %3703 = vmatmul.mubr.bf16.vlgmr.msra.gmra.mxu1 %v1916_v5 }
 0x455   :  { %3735 = vmatpush3.bf16.msra.mxu1 %v5012_v41 }
 0x456   :  { %v4104_v46 = vpop.eup %4103  ;;  %3736 = vmatprep.subr.bf16.mxu1 %v5019_v39 }
 0x457   :  { %v4106_v47 = vpop.eup %4105  ;;  %v1917_v19 = vpack.c.bf16 %v4104_v46, %v4102_v8 }
 0x458   :  { %v4108_v45 = vpop.eup %4107 }
 0x459   :  { %3737 = vmatpush3.bf16.msra.mxu1 %v5019_v39  ;;  %3706 = vmatprep.mubr.bf16.mxu1 %v1917_v19  ;;  %v1918_v2 = vpack.c.bf16 %v4106_v47, %v4108_v45 }
 0x45a   :  { %3738 = vmatprep.subr.bf16.mxu1 %v5026_v11 }
 0x45c   :  { %3707 = vmatmul.mubr.bf16.gmra.mxu1 %v1918_v2 }
 0x45d   :  { %3739 = vmatpush3.bf16.msra.mxu1 %v5026_v11  ;;  %3750 = vmatprep.mubr.bf16.mxu1 %v1915_v26 }
 0x45e   :  { %3740 = vmatprep.subr.bf16.mxu1 %v5033_v40 }
 0x461   :  { %3741 = vmatpush3.bf16.msra.mxu1 %v5033_v40 }
 0x462   :  { %3742 = vmatprep.subr.bf16.mxu1 %v5040_v18 }
 0x465   :  { %3743 = vmatpush3.bf16.msra.mxu1 %v5040_v18 }
 0x466   :  { %3744 = vmatprep.subr.bf16.mxu1 %v5047_v21 }
 0x469   :  { %3745 = vmatpush3.bf16.msra.mxu1 %v5047_v21 }
 0x46a   :  { %3746 = vmatprep.subr.bf16.mxu1 %v5054_v60 }
 0x46d   :  { %3747 = vmatpush3.bf16.msra.mxu1 %v5054_v60 }
 0x46e   :  { %3748 = vmatprep.subr.bf16.mxu1 %v5061_v33 }
 0x471   :  { %3749 = vmatpush3.bf16.msra.mxu1 %v5061_v33 }
 0x472   :  { %3782 = vmatprep.subr.bf16.mxu1 %v4812_v10 }
 0x474   :  { %3751 = vmatmul.mubr.bf16.vlgmr.msra.gmra.mxu1 %v1916_v5 }
 0x475   :  { %3754 = vmatprep.mubr.bf16.mxu1 %v1917_v19  ;;  %3783 = vmatpush3.bf16.msra.mxu1 %v4812_v10 }
 0x476   :  { %3784 = vmatprep.subr.bf16.mxu1 %v4821_v13 }
 0x479   :  { %3785 = vmatpush3.bf16.msra.mxu1 %v4821_v13 }
 0x47a   :  { %3786 = vmatprep.subr.bf16.mxu1 %v4832_v25 }
 0x47c   :  { %3755 = vmatmul.mubr.bf16.gmra.mxu1 %v1918_v2 }
 0x47d   :  { %3787 = vmatpush3.bf16.msra.mxu1 %v4832_v25 }
 0x47e   :  { %3788 = vmatprep.subr.bf16.mxu1 %v4843_v9 }
 0x481   :  { %3789 = vmatpush3.bf16.msra.mxu1 %v4843_v9 }
 0x482   :  { %3790 = vmatprep.subr.bf16.mxu1 %v4856_v22 }
 0x485   :  { %3791 = vmatpush3.bf16.msra.mxu1 %v4856_v22 }
 0x486   :  { %3792 = vmatprep.subr.bf16.mxu1 %v5078_v3 }
 0x489   :  { %3793 = vmatpush3.bf16.msra.mxu1 %v5078_v3 }
 0x48a   :  { %3794 = vmatprep.subr.bf16.mxu1 %v5085_v6 }
 0x48d   :  { %3795 = vmatpush3.bf16.msra.mxu1 %v5085_v6 }
 0x48e   :  { %3796 = vmatprep.subr.bf16.mxu1 %v5092_v34 }
 0x491   :  { %3797 = vmatpush3.bf16.msra.mxu1 %v5092_v34 }
 0x492   :  { %3830 = vmatprep.subr.bf16.mxu1 %v5163_v17 }
 0x4f4   :  { %v3656_v10 = vpop.f32.mrf.mxu1 }
 0x4f6   :  { %v1803_v13 = vpop.f32.mrf.mxu1 }
 0x4f8   :  { %v3657_v25 = vpop.f32.mrf.mxu1 }
 0x4fa   :  { %v1806_v9 = vpop.f32.mrf.mxu1 }
 0x4fc   :  { %v3660_v31 = vpop.f32.mrf.mxu1 }
 0x4fe   :  { %v1819_v22 = vpop.f32.mrf.mxu1 }
 0x500   :  { %v3661_v14 = vpop.f32.mrf.mxu1 }
 0x502   :  { %v1822_v7 = vpop.f32.mrf.mxu1 }
 0x514   :  { %v3704_v59 = vpop.f32.mrf.mxu1 }
 0x515   :  { %v1962_v63 = vadd.f32 %v3704_v59, %v3656_v10 }
 0x516   :  { %v1953_v58 = vpop.f32.mrf.mxu1 }
 0x517   :  { %v1954_v37 = vadd.f32 %v1953_v58, %v1803_v13  ;;  %v1986_v16 = vadd.f32 %v4969_v0, %v1962_v63  ;;  %v5496_v13 = vld [vmem:[#allocation7_spill] sm:$0xff]  ;;  %v5499_v58 = vld [vmem:[#allocation6_spill] sm:$0xff] }
 0x518   :  { %v3705_v42 = vpop.f32.mrf.mxu1 }
 0x519   :  { %v1984_v57 = vadd.f32 %v4969_v0, %v1954_v37  ;;  %v1965_v29 = vadd.f32 %v3705_v42, %v3657_v25 }
 0x51a   :  { %v1956_v36 = vpop.f32.mrf.mxu1 }
 0x51b   :  { %v1987_v15 = vadd.f32 %v4969_v0, %v1965_v29  ;;  %v1957_v32 = vadd.f32 %v1956_v36, %v1806_v9  ;;  %4109 = vtanh.f32 %v1984_v57  ;;  %v5500_v57 = vld [vmem:[#allocation11_spill] sm:$0xff] }
 0x51c   :  { %v3708_v30 = vpop.f32.mrf.mxu1 }
 0x51d   :  { %v1985_v20 = vadd.f32 %v4969_v0, %v1957_v32  ;;  %4111 = vtanh.f32 %v1987_v15  ;;  %v1978_v4 = vadd.f32 %v3708_v30, %v3660_v31  ;;  %v5497_v31 = vld [vmem:[#allocation8_spill] sm:$0xff]  ;;  %v5502_v30 = vld [vmem:[#allocation13_spill] sm:$0xff] }
 0x51e   :  { %v1969_v24 = vpop.f32.mrf.mxu1  ;;  %v5501_v15 = vld [vmem:[#allocation12_spill] sm:$0xff] }
 0x51f   :  { %4113 = vtanh.f32 %v1985_v20  ;;  %v1970_v28 = vadd.f32 %v1969_v24, %v1819_v22  ;;  %v1990_v27 = vadd.f32 %v4969_v0, %v1978_v4  ;;  %v5503_v24 = vld [vmem:[#allocation10_spill] sm:$0xff] }
 0x520   :  { %4115 = vtanh.f32 %v1986_v16  ;;  %v3709_v49 = vpop.f32.mrf.mxu1 }
 0x521   :  { %v1988_v38 = vadd.f32 %v4969_v0, %v1970_v28  ;;  %v1981_v23 = vadd.f32 %v3709_v49, %v3661_v14 }
 0x522   :  { %v1972_v51 = vpop.f32.mrf.mxu1 }
 0x523   :  { %v1991_v48 = vadd.f32 %v4969_v0, %v1981_v23  ;;  %v1973_v43 = vadd.f32 %v1972_v51, %v1822_v7  ;;  %4117 = vtanh.f32 %v1988_v38  ;;  %v5498_v7 = vld [vmem:[#allocation9_spill] sm:$0xff] }
 0x525   :  { %v1989_v12 = vadd.f32 %v4969_v0, %v1973_v43  ;;  %4119 = vtanh.f32 %v1991_v48 }
 0x527   :  { %4121 = vtanh.f32 %v1989_v12 }
 0x528   :  { %4123 = vtanh.f32 %v1990_v27  ;;  %v4110_v54 = vpop.eup %4109 }
 0x52a   :  { %v4112_v44 = vpop.eup %4111 }
 0x52c   :  { %v4114_v55 = vpop.eup %4113 }
 0x52d   :  { %v4116_v26 = vpop.eup %4115  ;;  %v2000_v62 = vpack.c.bf16 %v4114_v55, %v4110_v54 }
 0x52e   :  { %v2001_v5 = vpack.c.bf16 %v4112_v44, %v4116_v26 }
 0x52f   :  { %3726 = vmatprep.mubr.bf16.mxu0 %v2000_v62 }
 0x530   :  { %3727 = vmatmul.mubr.bf16.vlgmr.msra.gmra.mxu0 %v2001_v5  ;;  %v4118_v8 = vpop.eup %4117 }
 0x531   :  { %3759 = vmatpush3.bf16.msra.mxu0 %v5163_v17 }
 0x532   :  { %3760 = vmatprep.subr.bf16.mxu0 %v5178_v56  ;;  %v4120_v46 = vpop.eup %4119 }
 0x534   :  { %v4122_v47 = vpop.eup %4121  ;;  %v3752_v19 = vpop.f32.mrf.mxu1 }
 0x535   :  { %v4124_v0 = vpop.eup %4123  ;;  %3761 = vmatpush3.bf16.msra.mxu0 %v5178_v56  ;;  %v2002_v45 = vpack.c.bf16 %v4122_v47, %v4118_v8  ;;  %v2145_v37 = vadd.f32 %v3752_v19, %v5499_v58 }
 0x536   :  { %v2112_v2 = vpop.f32.mrf.mxu1  ;;  %3762 = vmatprep.subr.bf16.mxu0 %v5185_v61  ;;  %v2003_v10 = vpack.c.bf16 %v4120_v46, %v4124_v0 }
 0x537   :  { %3730 = vmatprep.mubr.bf16.mxu0 %v2002_v45  ;;  %v2143_v25 = vadd.f32 %v2112_v2, %v5496_v13 }
 0x538   :  { %3731 = vmatmul.mubr.bf16.gmra.mxu0 %v2003_v10  ;;  %v3753_v9 = vpop.f32.mrf.mxu1 }
 0x539   :  { %3763 = vmatpush3.bf16.msra.mxu0 %v5185_v61  ;;  %v2146_v22 = vadd.f32 %v3753_v9, %v5497_v31  ;;  %4125 = vtanh.f32 %v2143_v25 }
 0x53a   :  { %v2115_v14 = vpop.f32.mrf.mxu1  ;;  %3764 = vmatprep.subr.bf16.mxu0 %v5194_v35 }
 0x53b   :  { %v2144_v59 = vadd.f32 %v2115_v14, %v5498_v7 }
 0x53c   :  { %v3756_v63 = vpop.f32.mrf.mxu1 }
 0x53d   :  { %4127 = vtanh.f32 %v2144_v59  ;;  %3765 = vmatpush3.bf16.msra.mxu0 %v5194_v35  ;;  %v2149_v28 = vadd.f32 %v3756_v63, %v5503_v24 }
 0x53e   :  { %4129 = vtanh.f32 %v2146_v22  ;;  %v2128_v42 = vpop.f32.mrf.mxu1  ;;  %3766 = vmatprep.subr.bf16.mxu0 %v5203_v50 }
 0x53f   :  { %4131 = vtanh.f32 %v2145_v37  ;;  %v2147_v29 = vadd.f32 %v2128_v42, %v5500_v57 }
 0x540   :  { %v3757_v36 = vpop.f32.mrf.mxu1 }
 0x541   :  { %3767 = vmatpush3.bf16.msra.mxu0 %v5203_v50  ;;  %v2150_v32 = vadd.f32 %v3757_v36, %v5501_v15  ;;  %4133 = vtanh.f32 %v2147_v29 }
 0x542   :  { %v2131_v16 = vpop.f32.mrf.mxu1  ;;  %3768 = vmatprep.subr.bf16.mxu0 %v5212_v1 }
 0x543   :  { %v2148_v20 = vadd.f32 %v2131_v16, %v5502_v30 }
 0x545   :  { %4135 = vtanh.f32 %v2148_v20  ;;  %3769 = vmatpush3.bf16.msra.mxu0 %v5212_v1 }
 0x546   :  { %4137 = vtanh.f32 %v2150_v32  ;;  %3770 = vmatprep.subr.bf16.mxu0 %v5221_v53  ;;  %v4126_v4 = vpop.eup %4125 }
 0x547   :  { %4139 = vtanh.f32 %v2149_v28 }
 0x549   :  { %3771 = vmatpush3.bf16.msra.mxu0 %v5221_v53 }
 0x54a   :  { %v4128_v49 = vpop.eup %4127  ;;  %3772 = vmatprep.subr.bf16.mxu0 %v5228_v52 }
 0x54b   :  { %v4130_v38 = vpop.eup %4129  ;;  %v2159_v23 = vpack.c.bf16 %v4128_v49, %v4126_v4 }
 0x54c   :  { %v4132_v51 = vpop.eup %4131 }
 0x54d   :  { %3773 = vmatpush3.bf16.msra.mxu0 %v5228_v52  ;;  %3774 = vmatprep.mubr.bf16.mxu0 %v2159_v23  ;;  %v2160_v48 = vpack.c.bf16 %v4130_v38, %v4132_v51 }
 0x54e   :  { %3806 = vmatprep.subr.bf16.mxu0 %v5012_v41  ;;  %v4134_v43 = vpop.eup %4133 }
 0x550   :  { %3775 = vmatmul.mubr.bf16.vlgmr.msra.gmra.mxu0 %v2160_v48 }
 0x551   :  { %3807 = vmatpush3.bf16.msra.mxu0 %v5012_v41  ;;  %v4245_v41 = vld [vmem:[%s5467_s4 + $0x38] sm:$0xff]  }
 0x552   :  { %v4136_v27 = vpop.eup %4135  ;;  %3808 = vmatprep.subr.bf16.mxu0 %v5019_v39 }
 0x553   :  { %v4138_v12 = vpop.eup %4137  ;;  %v2161_v54 = vpack.c.bf16 %v4136_v27, %v4134_v43 }
 0x554   :  { %v4140_v44 = vpop.eup %4139 }
 0x555   :  { %3809 = vmatpush3.bf16.msra.mxu0 %v5019_v39  ;;  %3778 = vmatprep.mubr.bf16.mxu0 %v2161_v54  ;;  %v2162_v55 = vpack.c.bf16 %v4138_v12, %v4140_v44  ;;  %v4246_v39 = vld [vmem:[%s5467_s4 + $0x30] sm:$0xff]   ;;  %v5504_v12 = vld [vmem:[#allocation15_spill] sm:$0xff] }
 0x556   :  { %3810 = vmatprep.subr.bf16.mxu0 %v5026_v11 }
 0x558   :  { %3779 = vmatmul.mubr.bf16.gmra.mxu0 %v2162_v55 }
 0x559   :  { %3811 = vmatpush3.bf16.msra.mxu0 %v5026_v11  ;;  %3822 = vmatprep.mubr.bf16.mxu0 %v2159_v23  ;;  %v4247_v11 = vld [vmem:[%s5467_s4 + $0x28] sm:$0xff]  }
 0x55a   :  { %3812 = vmatprep.subr.bf16.mxu0 %v5033_v40 }
 0x55d   :  { %3813 = vmatpush3.bf16.msra.mxu0 %v5033_v40  ;;  %v4248_v40 = vld [vmem:[%s5467_s4 + $0x20] sm:$0xff]  }
 0x55e   :  { %3814 = vmatprep.subr.bf16.mxu0 %v5040_v18 }
 0x561   :  { %3815 = vmatpush3.bf16.msra.mxu0 %v5040_v18  ;;  %v4249_v18 = vld [vmem:[%s5467_s4 + $0x18] sm:$0xff]  }
 0x562   :  { %3816 = vmatprep.subr.bf16.mxu0 %v5047_v21 }
 0x565   :  { %3817 = vmatpush3.bf16.msra.mxu0 %v5047_v21 }
 0x566   :  { %3818 = vmatprep.subr.bf16.mxu0 %v5054_v60 }
 0x569   :  { %3819 = vmatpush3.bf16.msra.mxu0 %v5054_v60 }
 0x56a   :  { %3820 = vmatprep.subr.bf16.mxu0 %v5061_v33 }
 0x56d   :  { %3821 = vmatpush3.bf16.msra.mxu0 %v5061_v33 }
 0x56e   :  { %3854 = vmatprep.subr.bf16.mxu0 %v4245_v41 }
 0x570   :  { %3823 = vmatmul.mubr.bf16.vlgmr.msra.gmra.mxu0 %v2160_v48 }
 0x571   :  { %3826 = vmatprep.mubr.bf16.mxu0 %v2161_v54  ;;  %3855 = vmatpush3.bf16.msra.mxu0 %v4245_v41 }
 0x572   :  { %3856 = vmatprep.subr.bf16.mxu0 %v4246_v39 }
 0x575   :  { %3857 = vmatpush3.bf16.msra.mxu0 %v4246_v39 }
 0x576   :  { %3858 = vmatprep.subr.bf16.mxu0 %v4247_v11 }
 0x578   :  { %3827 = vmatmul.mubr.bf16.gmra.mxu0 %v2162_v55  ;;  %v5505_v55 = vld [vmem:[#allocation16_spill] sm:$0xff] }
 0x579   :  { %3859 = vmatpush3.bf16.msra.mxu0 %v4247_v11  ;;  %v5506_v11 = vld [vmem:[#allocation17_spill] sm:$0xff] }
 0x57a   :  { %3860 = vmatprep.subr.bf16.mxu0 %v4248_v40 }
 0x57d   :  { %3861 = vmatpush3.bf16.msra.mxu0 %v4248_v40 }
 0x57e   :  { %3862 = vmatprep.subr.bf16.mxu0 %v4249_v18 }
 0x581   :  { %3863 = vmatpush3.bf16.msra.mxu0 %v4249_v18  ;;  %v5507_v18 = vld [vmem:[#allocation14_spill] sm:$0xff] }
 0x582   :  { %3864 = vmatprep.subr.bf16.mxu0 %v5078_v3 }
 0x585   :  { %3865 = vmatpush3.bf16.msra.mxu0 %v5078_v3 }
 0x586   :  { %3866 = vmatprep.subr.bf16.mxu0 %v5085_v6 }
 0x589   :  { %3867 = vmatpush3.bf16.msra.mxu0 %v5085_v6  ;;  %v5337_v6 = vld [vmem:[%s5468_s5] ss:$0 sm:$0xff] }
 0x58a   :  { %3868 = vmatprep.subr.bf16.mxu0 %v5092_v34 }
 0x58d   :  { %3869 = vmatpush3.bf16.msra.mxu0 %v5092_v34 }
 0x58e   :  { %3902 = vmatprep.subr.bf16.mxu0 %v5163_v17 }
 0x5f0   :  { %v3728_v21 = vpop.f32.mrf.mxu0 }
 0x5f2   :  { %v2047_v60 = vpop.f32.mrf.mxu0 }
 0x5f4   :  { %v3729_v33 = vpop.f32.mrf.mxu0 }
 0x5f6   :  { %v2050_v26 = vpop.f32.mrf.mxu0 }
 0x5f8   :  { %v3732_v62 = vpop.f32.mrf.mxu0 }
 0x5fa   :  { %v2063_v5 = vpop.f32.mrf.mxu0 }
 0x5fc   :  { %v3733_v8 = vpop.f32.mrf.mxu0 }
 0x5fe   :  { %v2066_v46 = vpop.f32.mrf.mxu0 }
 0x610   :  { %v3776_v47 = vpop.f32.mrf.mxu0 }
 0x611   :  { %v2206_v0 = vadd.f32 %v3776_v47, %v3728_v21 }
 0x612   :  { %v2197_v3 = vpop.f32.mrf.mxu0 }
 0x613   :  { %v2198_v19 = vadd.f32 %v2197_v3, %v2047_v60  ;;  %v2230_v9 = vadd.f32 %v5337_v6, %v2206_v0  ;;  %v5510_v3 = vld [vmem:[#allocation21_spill] sm:$0xff]  ;;  %v5511_v0 = vld [vmem:[#allocation18_spill] sm:$0xff] }
 0x614   :  { %v3777_v45 = vpop.f32.mrf.mxu0 }
 0x615   :  { %v2228_v34 = vadd.f32 %v5337_v6, %v2198_v19  ;;  %v2209_v2 = vadd.f32 %v3777_v45, %v3729_v33 }
 0x616   :  { %v2200_v10 = vpop.f32.mrf.mxu0 }
 0x617   :  { %v2231_v13 = vadd.f32 %v5337_v6, %v2209_v2  ;;  %v2201_v25 = vadd.f32 %v2200_v10, %v2050_v26  ;;  %4141 = vtanh.f32 %v2228_v34  ;;  %v5508_v26 = vld [vmem:[#allocation19_spill] sm:$0xff] }
 0x618   :  { %v3780_v31 = vpop.f32.mrf.mxu0 }
 0x619   :  { %v2229_v22 = vadd.f32 %v5337_v6, %v2201_v25  ;;  %4143 = vtanh.f32 %v2231_v13  ;;  %v2222_v59 = vadd.f32 %v3780_v31, %v3732_v62  ;;  %v4251_v31 = vld [vmem:[%s5465_s2 + $0x38] sm:$0xff]  }
 0x61a   :  { %v2213_v14 = vpop.f32.mrf.mxu0 }
 0x61b   :  { %4145 = vtanh.f32 %v2229_v22  ;;  %v2214_v7 = vadd.f32 %v2213_v14, %v2063_v5  ;;  %v2234_v36 = vadd.f32 %v5337_v6, %v2222_v59 }
 0x61c   :  { %4147 = vtanh.f32 %v2230_v9  ;;  %v3781_v58 = vpop.f32.mrf.mxu0 }
 0x61d   :  { %v2232_v37 = vadd.f32 %v5337_v6, %v2214_v7  ;;  %v2225_v63 = vadd.f32 %v3781_v58, %v3733_v8  ;;  %v5509_v8 = vld [vmem:[#allocation20_spill] sm:$0xff] }
 0x61e   :  { %v2216_v42 = vpop.f32.mrf.mxu0  ;;  %v4252_v7 = vld [vmem:[%s5465_s2 + $0x30] sm:$0xff]  }
 0x61f   :  { %v2235_v57 = vadd.f32 %v5337_v6, %v2225_v63  ;;  %v2217_v29 = vadd.f32 %v2216_v42, %v2066_v46  ;;  %4149 = vtanh.f32 %v2232_v37  ;;  %v4253_v42 = vld [vmem:[%s5465_s2 + $0x28] sm:$0xff]  }
 0x621   :  { %v2233_v15 = vadd.f32 %v5337_v6, %v2217_v29  ;;  %4151 = vtanh.f32 %v2235_v57  ;;  %v4254_v57 = vld [vmem:[%s5465_s2 + $0x20] sm:$0xff]   ;;  %v4255_v29 = vld [vmem:[%s5465_s2 + $0x18] sm:$0xff]  }
 0x623   :  { %4153 = vtanh.f32 %v2233_v15  ;;  %v4257_v15 = vld [vmem:[%s5465_s2 + $0x8] sm:$0xff]  }
 0x624   :  { %4155 = vtanh.f32 %v2234_v36  ;;  %v4142_v32 = vpop.eup %4141  ;;  %v4256_v36 = vld [vmem:[%s5465_s2 + $0x10] sm:$0xff]  }
 0x626   :  { %v4144_v16 = vpop.eup %4143 }
 0x628   :  { %v4146_v30 = vpop.eup %4145 }
 0x629   :  { %v4148_v20 = vpop.eup %4147  ;;  %v2244_v24 = vpack.c.bf16 %v4146_v30, %v4142_v32  ;;  %v4258_v32 = vld [vmem:[%s5465_s2] sm:$0xff]  }
 0x62a   :  { %v2245_v28 = vpack.c.bf16 %v4144_v16, %v4148_v20 }
 0x62b   :  { %3798 = vmatprep.mubr.bf16.mxu1 %v2244_v24 }
 0x62c   :  { %3799 = vmatmul.mubr.bf16.vlgmr.msra.gmra.mxu1 %v2245_v28  ;;  %v4150_v4 = vpop.eup %4149 }
 0x62d   :  { %3831 = vmatpush3.bf16.msra.mxu1 %v5163_v17 }
 0x62e   :  { %3832 = vmatprep.subr.bf16.mxu1 %v5178_v56  ;;  %v4152_v49 = vpop.eup %4151 }
 0x630   :  { %v4154_v38 = vpop.eup %4153  ;;  %v3824_v23 = vpop.f32.mrf.mxu0 }
 0x631   :  { %v4156_v51 = vpop.eup %4155  ;;  %3833 = vmatpush3.bf16.msra.mxu1 %v5178_v56  ;;  %v2246_v48 = vpack.c.bf16 %v4154_v38, %v4150_v4  ;;  %v2389_v21 = vadd.f32 %v3824_v23, %v5507_v18 }
 0x632   :  { %v2356_v43 = vpop.f32.mrf.mxu0  ;;  %3834 = vmatprep.subr.bf16.mxu1 %v5185_v61  ;;  %v2247_v27 = vpack.c.bf16 %v4152_v49, %v4156_v51 }
 0x633   :  { %3802 = vmatprep.mubr.bf16.mxu1 %v2246_v48  ;;  %v2387_v54 = vadd.f32 %v2356_v43, %v5504_v12 }
 0x634   :  { %3803 = vmatmul.mubr.bf16.gmra.mxu1 %v2247_v27  ;;  %v3825_v44 = vpop.f32.mrf.mxu0 }
 0x635   :  { %3835 = vmatpush3.bf16.msra.mxu1 %v5185_v61  ;;  %v2390_v41 = vadd.f32 %v3825_v44, %v5505_v55  ;;  %4157 = vtanh.f32 %v2387_v54 }
 0x636   :  { %v2359_v39 = vpop.f32.mrf.mxu0  ;;  %3836 = vmatprep.subr.bf16.mxu1 %v5194_v35 }
 0x637   :  { %v2388_v40 = vadd.f32 %v2359_v39, %v5506_v11 }
 0x638   :  { %v3828_v60 = vpop.f32.mrf.mxu0 }
 0x639   :  { %4159 = vtanh.f32 %v2388_v40  ;;  %3837 = vmatpush3.bf16.msra.mxu1 %v5194_v35  ;;  %v2393_v45 = vadd.f32 %v3828_v60, %v5511_v0 }
 0x63a   :  { %4161 = vtanh.f32 %v2390_v41  ;;  %v2372_v33 = vpop.f32.mrf.mxu0  ;;  %3838 = vmatprep.subr.bf16.mxu1 %v5203_v50 }
 0x63b   :  { %4163 = vtanh.f32 %v2389_v21  ;;  %v2391_v62 = vadd.f32 %v2372_v33, %v5508_v26 }
 0x63c   :  { %v3829_v5 = vpop.f32.mrf.mxu0 }
 0x63d   :  { %3839 = vmatpush3.bf16.msra.mxu1 %v5203_v50  ;;  %v2394_v46 = vadd.f32 %v3829_v5, %v5509_v8  ;;  %4165 = vtanh.f32 %v2391_v62 }
 0x63e   :  { %v2375_v47 = vpop.f32.mrf.mxu0  ;;  %3840 = vmatprep.subr.bf16.mxu1 %v5212_v1 }
 0x63f   :  { %v2392_v19 = vadd.f32 %v2375_v47, %v5510_v3 }
 0x641   :  { %4167 = vtanh.f32 %v2392_v19  ;;  %3841 = vmatpush3.bf16.msra.mxu1 %v5212_v1 }
 0x642   :  { %4169 = vtanh.f32 %v2394_v46  ;;  %3842 = vmatprep.subr.bf16.mxu1 %v5221_v53  ;;  %v4158_v34 = vpop.eup %4157 }
 0x643   :  { %4171 = vtanh.f32 %v2393_v45 }
 0x645   :  { %3843 = vmatpush3.bf16.msra.mxu1 %v5221_v53 }
 0x646   :  { %v4160_v2 = vpop.eup %4159  ;;  %3844 = vmatprep.subr.bf16.mxu1 %v5228_v52 }
 0x647   :  { %v4162_v10 = vpop.eup %4161  ;;  %v2403_v13 = vpack.c.bf16 %v4160_v2, %v4158_v34 }
 0x648   :  { %v4164_v25 = vpop.eup %4163 }
 0x649   :  { %3845 = vmatpush3.bf16.msra.mxu1 %v5228_v52  ;;  %3846 = vmatprep.mubr.bf16.mxu1 %v2403_v13  ;;  %v2404_v9 = vpack.c.bf16 %v4162_v10, %v4164_v25 }
 0x64a   :  { %3878 = vmatprep.subr.bf16.mxu1 %v4251_v31  ;;  %v4166_v22 = vpop.eup %4165 }
 0x64c   :  { %3847 = vmatmul.mubr.bf16.vlgmr.msra.gmra.mxu1 %v2404_v9 }
 0x64d   :  { %3879 = vmatpush3.bf16.msra.mxu1 %v4251_v31 }
 0x64e   :  { %v4168_v14 = vpop.eup %4167  ;;  %3880 = vmatprep.subr.bf16.mxu1 %v4252_v7 }
 0x64f   :  { %v4170_v59 = vpop.eup %4169  ;;  %v2405_v58 = vpack.c.bf16 %v4168_v14, %v4166_v22 }
 0x650   :  { %v4172_v37 = vpop.eup %4171 }
 0x651   :  { %3881 = vmatpush3.bf16.msra.mxu1 %v4252_v7  ;;  %3850 = vmatprep.mubr.bf16.mxu1 %v2405_v58  ;;  %v2406_v63 = vpack.c.bf16 %v4170_v59, %v4172_v37 }
 0x652   :  { %3882 = vmatprep.subr.bf16.mxu1 %v4253_v42 }
 0x654   :  { %3851 = vmatmul.mubr.bf16.gmra.mxu1 %v2406_v63 }
 0x655   :  { %3883 = vmatpush3.bf16.msra.mxu1 %v4253_v42  ;;  %3894 = vmatprep.mubr.bf16.mxu1 %v2403_v13 }
 0x656   :  { %3884 = vmatprep.subr.bf16.mxu1 %v4254_v57 }
 0x659   :  { %3885 = vmatpush3.bf16.msra.mxu1 %v4254_v57 }
 0x65a   :  { %3886 = vmatprep.subr.bf16.mxu1 %v4255_v29 }
 0x65d   :  { %3887 = vmatpush3.bf16.msra.mxu1 %v4255_v29  ;;  %v5514_v29 = vld [vmem:[#allocation25_spill] sm:$0xff] }
 0x65e   :  { %3888 = vmatprep.subr.bf16.mxu1 %v4256_v36 }
 0x661   :  { %3889 = vmatpush3.bf16.msra.mxu1 %v4256_v36 }
 0x662   :  { %3890 = vmatprep.subr.bf16.mxu1 %v4257_v15 }
 0x665   :  { %3891 = vmatpush3.bf16.msra.mxu1 %v4257_v15 }
 0x666   :  { %3892 = vmatprep.subr.bf16.mxu1 %v4258_v32 }
 0x669   :  { %3893 = vmatpush3.bf16.msra.mxu1 %v4258_v32 }
 0x66c   :  { %3895 = vmatmul.mubr.bf16.vlgmr.msra.gmra.mxu1 %v2404_v9 }
 0x66d   :  { %3898 = vmatprep.mubr.bf16.mxu1 %v2405_v58  ;;  %v5512_v58 = vld [vmem:[#allocation23_spill] sm:$0xff] }
 0x674   :  { %3899 = vmatmul.mubr.bf16.gmra.mxu1 %v2406_v63 }
 0x6ec   :  { %v3800_v16 = vpop.f32.mrf.mxu1 }
 0x6ee   :  { %v2291_v30 = vpop.f32.mrf.mxu1 }
 0x6f0   :  { %v3801_v20 = vpop.f32.mrf.mxu1 }
 0x6f2   :  { %v2294_v24 = vpop.f32.mrf.mxu1 }
 0x6f4   :  { %v3804_v28 = vpop.f32.mrf.mxu1 }
 0x6f6   :  { %v2307_v4 = vpop.f32.mrf.mxu1 }
 0x6f8   :  { %v3805_v49 = vpop.f32.mrf.mxu1 }
 0x6fa   :  { %v2310_v38 = vpop.f32.mrf.mxu1 }
 0x70c   :  { %v3848_v23 = vpop.f32.mrf.mxu1 }
 0x70d   :  { %v2450_v43 = vadd.f32 %v3848_v23, %v3800_v16  ;;  %v5519_v23 = vld [vmem:[#allocation26_spill] sm:$0xff] }
 0x70e   :  { %v2441_v51 = vpop.f32.mrf.mxu1 }
 0x70f   :  { %v2442_v48 = vadd.f32 %v2441_v51, %v2291_v30  ;;  %v2474_v39 = vadd.f32 %v5337_v6, %v2450_v43 }
 0x710   :  { %v3849_v27 = vpop.f32.mrf.mxu1 }
 0x711   :  { %v2472_v12 = vadd.f32 %v5337_v6, %v2442_v48  ;;  %v2453_v54 = vadd.f32 %v3849_v27, %v3801_v20 }
 0x712   :  { %v2444_v44 = vpop.f32.mrf.mxu1 }
 0x713   :  { %v2475_v55 = vadd.f32 %v5337_v6, %v2453_v54  ;;  %v2445_v41 = vadd.f32 %v2444_v44, %v2294_v24  ;;  %4173 = vtanh.f32 %v2472_v12  ;;  %v5517_v24 = vld [vmem:[#allocation28_spill] sm:$0xff] }
 0x714   :  { %v3852_v11 = vpop.f32.mrf.mxu1 }
 0x715   :  { %v2473_v40 = vadd.f32 %v5337_v6, %v2445_v41  ;;  %4175 = vtanh.f32 %v2475_v55  ;;  %v2466_v60 = vadd.f32 %v3852_v11, %v3804_v28  ;;  %v3991_v11 = vld [vmem:[%s5469_s6 + $0x28] sm:$0xff]  }
 0x716   :  { %v2457_v18 = vpop.f32.mrf.mxu1 }
 0x717   :  { %4177 = vtanh.f32 %v2473_v40  ;;  %v2458_v21 = vadd.f32 %v2457_v18, %v2307_v4  ;;  %v2478_v47 = vadd.f32 %v5337_v6, %v2466_v60  ;;  %v3992_v40 = vld [vmem:[%s5469_s6 + $0x20] sm:$0xff]   ;;  %v3993_v18 = vld [vmem:[%s5469_s6 + $0x18] sm:$0xff]   ;;  %v3995_v60 = vld [vmem:[%s5469_s6 + $0x8] sm:$0xff]  }
 0x718   :  { %4179 = vtanh.f32 %v2474_v39  ;;  %v3853_v33 = vpop.f32.mrf.mxu1 }
 0x719   :  { %v2476_v26 = vadd.f32 %v5337_v6, %v2458_v21  ;;  %v2469_v62 = vadd.f32 %v3853_v33, %v3805_v49  ;;  %v5518_v49 = vld [vmem:[#allocation29_spill] sm:$0xff]  ;;  %v3994_v21 = vld [vmem:[%s5469_s6 + $0x10] sm:$0xff]   ;;  %v3996_v33 = vld [vmem:[%s5469_s6] sm:$0xff]  }
 0x71a   :  { %v2460_v5 = vpop.f32.mrf.mxu1 }
 0x71b   :  { %v2479_v8 = vadd.f32 %v5337_v6, %v2469_v62  ;;  %v2461_v46 = vadd.f32 %v2460_v5, %v2310_v38  ;;  %4181 = vtanh.f32 %v2476_v26 }
 0x71d   :  { %v2477_v3 = vadd.f32 %v5337_v6, %v2461_v46  ;;  %4183 = vtanh.f32 %v2479_v8 }
 0x71f   :  { %4185 = vtanh.f32 %v2477_v3 }
 0x720   :  { %4187 = vtanh.f32 %v2478_v47  ;;  %v4174_v19 = vpop.eup %4173 }
 0x722   :  { %v4176_v0 = vpop.eup %4175 }
 0x724   :  { %v4178_v45 = vpop.eup %4177 }
 0x725   :  { %v4180_v34 = vpop.eup %4179  ;;  %v2488_v2 = vpack.c.bf16 %v4178_v45, %v4174_v19 }
 0x726   :  { %v2489_v10 = vpack.c.bf16 %v4176_v0, %v4180_v34 }
 0x727   :  { %3870 = vmatprep.mubr.bf16.mxu0 %v2488_v2 }
 0x728   :  { %3871 = vmatmul.mubr.bf16.vlgmr.msra.gmra.mxu0 %v2489_v10  ;;  %v4182_v13 = vpop.eup %4181 }
 0x729   :  { %3903 = vmatpush3.bf16.msra.mxu0 %v5163_v17  ;;  %v5513_v17 = vld [vmem:[#allocation24_spill] sm:$0xff] }
 0x72a   :  { %3904 = vmatprep.subr.bf16.mxu0 %v5178_v56  ;;  %v4184_v25 = vpop.eup %4183 }
 0x72c   :  { %v4186_v9 = vpop.eup %4185  ;;  %v3896_v31 = vpop.f32.mrf.mxu1 }
 0x72d   :  { %v4188_v22 = vpop.eup %4187  ;;  %3905 = vmatpush3.bf16.msra.mxu0 %v5178_v56  ;;  %v2490_v14 = vpack.c.bf16 %v4186_v9, %v4182_v13  ;;  %v5515_v56 = vld [vmem:[#allocation22_spill] sm:$0xff] }
 0x72e   :  { %v2600_v7 = vpop.f32.mrf.mxu1  ;;  %3906 = vmatprep.subr.bf16.mxu0 %v5185_v61  ;;  %v2491_v59 = vpack.c.bf16 %v4184_v25, %v4188_v22  ;;  %v2633_v15 = vadd.f32 %v3896_v31, %v5515_v56 }
 0x72f   :  { %3874 = vmatprep.mubr.bf16.mxu0 %v2490_v14  ;;  %v2631_v37 = vadd.f32 %v2600_v7, %v5512_v58 }
 0x730   :  { %3875 = vmatmul.mubr.bf16.gmra.mxu0 %v2491_v59  ;;  %v3897_v63 = vpop.f32.mrf.mxu1 }
 0x731   :  { %3907 = vmatpush3.bf16.msra.mxu0 %v5185_v61  ;;  %v2634_v42 = vadd.f32 %v3897_v63, %v5513_v17  ;;  %4189 = vtanh.f32 %v2631_v37  ;;  %v5516_v61 = vld [vmem:[#allocation27_spill] sm:$0xff] }
 0x732   :  { %v2603_v57 = vpop.f32.mrf.mxu1  ;;  %3908 = vmatprep.subr.bf16.mxu0 %v5194_v35 }
 0x733   :  { %v2632_v36 = vadd.f32 %v2603_v57, %v5514_v29 }
 0x734   :  { %v3900_v32 = vpop.f32.mrf.mxu1 }
 0x735   :  { %4191 = vtanh.f32 %v2632_v36  ;;  %3909 = vmatpush3.bf16.msra.mxu0 %v5194_v35  ;;  %v2637_v51 = vadd.f32 %v3900_v32, %v5519_v23 }
 0x736   :  { %4193 = vtanh.f32 %v2634_v42  ;;  %v2616_v16 = vpop.f32.mrf.mxu1  ;;  %3910 = vmatprep.subr.bf16.mxu0 %v5203_v50 }
 0x737   :  { %4195 = vtanh.f32 %v2633_v15  ;;  %v2635_v30 = vadd.f32 %v2616_v16, %v5516_v61 }
 0x738   :  { %v3901_v20 = vpop.f32.mrf.mxu1 }
 0x739   :  { %3911 = vmatpush3.bf16.msra.mxu0 %v5203_v50  ;;  %v2638_v28 = vadd.f32 %v3901_v20, %v5517_v24  ;;  %4197 = vtanh.f32 %v2635_v30 }
 0x73a   :  { %v2619_v4 = vpop.f32.mrf.mxu1  ;;  %3912 = vmatprep.subr.bf16.mxu0 %v5212_v1 }
 0x73b   :  { %v2636_v38 = vadd.f32 %v2619_v4, %v5518_v49 }
 0x73d   :  { %4199 = vtanh.f32 %v2636_v38  ;;  %3913 = vmatpush3.bf16.msra.mxu0 %v5212_v1 }
 0x73e   :  { %4201 = vtanh.f32 %v2638_v28  ;;  %3914 = vmatprep.subr.bf16.mxu0 %v5221_v53  ;;  %v4190_v35 = vpop.eup %4189 }
 0x73f   :  { %4203 = vtanh.f32 %v2637_v51 }
 0x741   :  { %3915 = vmatpush3.bf16.msra.mxu0 %v5221_v53  ;;  %v3989_v53 = vld [vmem:[%s5469_s6 + $0x38] sm:$0xff]  }
 0x742   :  { %v4192_v50 = vpop.eup %4191  ;;  %3916 = vmatprep.subr.bf16.mxu0 %v5228_v52  ;;  %3926 = vmatprep.subr.bf16.mxu1 %v3989_v53 }
 0x743   :  { %v4194_v48 = vpop.eup %4193  ;;  %v2647_v43 = vpack.c.bf16 %v4192_v50, %v4190_v35  ;;  %3927 = vmatpush3.bf16.msra.mxu1 %v3989_v53 }
 0x744   :  { %v4196_v27 = vpop.eup %4195 }
 0x745   :  { %3917 = vmatpush3.bf16.msra.mxu0 %v5228_v52  ;;  %3918 = vmatprep.mubr.bf16.mxu0 %v2647_v43  ;;  %v2648_v12 = vpack.c.bf16 %v4194_v48, %v4196_v27  ;;  %v3990_v52 = vld [vmem:[%s5469_s6 + $0x30] sm:$0xff]  }
 0x746   :  { %v4198_v54 = vpop.eup %4197  ;;  %3928 = vmatprep.subr.bf16.mxu1 %v3990_v52 }
 0x747   :  { %3929 = vmatpush3.bf16.msra.mxu1 %v3990_v52 }
 0x748   :  { %3919 = vmatmul.mubr.bf16.vlgmr.msra.gmra.mxu0 %v2648_v12  ;;  %3930 = vmatprep.subr.bf16.mxu1 %v3991_v11 }
 0x74a   :  { %v4200_v1 = vpop.eup %4199 }
 0x74b   :  { %v4202_v44 = vpop.eup %4201  ;;  %v2649_v55 = vpack.c.bf16 %v4200_v1, %v4198_v54  ;;  %3931 = vmatpush3.bf16.msra.mxu1 %v3991_v11 }
 0x74c   :  { %v4204_v41 = vpop.eup %4203  ;;  %3932 = vmatprep.subr.bf16.mxu1 %v3992_v40 }
 0x74d   :  { %3922 = vmatprep.mubr.bf16.mxu0 %v2649_v55  ;;  %v2650_v39 = vpack.c.bf16 %v4202_v44, %v4204_v41 }
 0x74f   :  { %3933 = vmatpush3.bf16.msra.mxu1 %v3992_v40 }
 0x750   :  { %3923 = vmatmul.mubr.bf16.gmra.mxu0 %v2650_v39  ;;  %3934 = vmatprep.subr.bf16.mxu1 %v3993_v18 }
 0x753   :  { %3935 = vmatpush3.bf16.msra.mxu1 %v3993_v18 }
 0x754   :  { %3936 = vmatprep.subr.bf16.mxu1 %v3994_v21 }
 0x757   :  { %3937 = vmatpush3.bf16.msra.mxu1 %v3994_v21 }
 0x758   :  { %3938 = vmatprep.subr.bf16.mxu1 %v3995_v60 }
 0x75b   :  { %3939 = vmatpush3.bf16.msra.mxu1 %v3995_v60 }
 0x75c   :  { %3940 = vmatprep.subr.bf16.mxu1 %v3996_v33 }
 0x75f   :  { %3941 = vmatpush3.bf16.msra.mxu1 %v3996_v33 }
 0x7e8   :  { %v3872_v26 = vpop.f32.mrf.mxu0 }
 0x7ea   :  { %v2535_v62 = vpop.f32.mrf.mxu0 }
 0x7ec   :  { %v3873_v5 = vpop.f32.mrf.mxu0 }
 0x7ee   :  { %v2538_v8 = vpop.f32.mrf.mxu0 }
 0x7f0   :  { %v3876_v46 = vpop.f32.mrf.mxu0 }
 0x7f2   :  { %v2551_v47 = vpop.f32.mrf.mxu0 }
 0x7f4   :  { %v3877_v3 = vpop.f32.mrf.mxu0 }
 0x7f6   :  { %v2554_v19 = vpop.f32.mrf.mxu0 }
 0x808   :  { %v3920_v0 = vpop.f32.mrf.mxu0 }
 0x809   :  { %v2694_v2 = vadd.f32 %v3920_v0, %v3872_v26 }
 0x80a   :  { %v2685_v45 = vpop.f32.mrf.mxu0 }
 0x80b   :  { %v2686_v34 = vadd.f32 %v2685_v45, %v2535_v62  ;;  %v2718_v14 = vadd.f32 %v5337_v6, %v2694_v2 }
 0x80c   :  { %v3921_v10 = vpop.f32.mrf.mxu0 }
 0x80d   :  { %v2716_v13 = vadd.f32 %v5337_v6, %v2686_v34  ;;  %v2697_v25 = vadd.f32 %v3921_v10, %v3873_v5 }
 0x80e   :  { %v2688_v9 = vpop.f32.mrf.mxu0 }
 0x80f   :  { %v2719_v31 = vadd.f32 %v5337_v6, %v2697_v25  ;;  %v2689_v22 = vadd.f32 %v2688_v9, %v2538_v8  ;;  %4205 = vtanh.f32 %v2716_v13 }
 0x810   :  { %v3924_v7 = vpop.f32.mrf.mxu0 }
 0x811   :  { %v2717_v59 = vadd.f32 %v5337_v6, %v2689_v22  ;;  %4207 = vtanh.f32 %v2719_v31  ;;  %v2710_v63 = vadd.f32 %v3924_v7, %v3876_v46 }
 0x812   :  { %v2701_v58 = vpop.f32.mrf.mxu0 }
 0x813   :  { %4209 = vtanh.f32 %v2717_v59  ;;  %v2702_v37 = vadd.f32 %v2701_v58, %v2551_v47  ;;  %v2722_v15 = vadd.f32 %v5337_v6, %v2710_v63 }
 0x814   :  { %4211 = vtanh.f32 %v2718_v14  ;;  %v3925_v17 = vpop.f32.mrf.mxu0 }
 0x815   :  { %v2720_v42 = vadd.f32 %v5337_v6, %v2702_v37  ;;  %v2713_v57 = vadd.f32 %v3925_v17, %v3877_v3 }
 0x816   :  { %v2704_v29 = vpop.f32.mrf.mxu0 }
 0x817   :  { %v2723_v36 = vadd.f32 %v5337_v6, %v2713_v57  ;;  %v2705_v56 = vadd.f32 %v2704_v29, %v2554_v19  ;;  %4213 = vtanh.f32 %v2720_v42 }
 0x819   :  { %v2721_v32 = vadd.f32 %v5337_v6, %v2705_v56  ;;  %4215 = vtanh.f32 %v2723_v36  ;;  %v3041_v6 = vld [vmem:[%s5470_s7] ss:$0 sm:$0xff]  ;;  %s4259_s7 = scalar_lea.vmem %s2886_s16, 1024 }
 0x81a   :  { %p4260_p0 = scmp.ne.s32.totalorder %s2886_s16, %s4259_s7  ;;  %p4265_p2 = scmp.lt.s32.totalorder %s4259_s7, %s4259_s7 }
 0x81b   :  { %4217 = vtanh.f32 %v2721_v32 }
 0x81c   :  { %4219 = vtanh.f32 %v2722_v15  ;;  %v4206_v16 = vpop.eup %4205  ;;  %p4266_p3 = por %p4265_p2, %p4264_p1 }
 0x81e   :  { %v4208_v61 = vpop.eup %4207  ;;  %p4267_p4 = pnand %p4266_p3, %p4260_p0 }
 0x820   :  { %v4210_v30 = vpop.eup %4209 }
 0x821   :  { %v4212_v20 = vpop.eup %4211  ;;  %v2732_v24 = vpack.c.bf16 %v4210_v30, %v4206_v16 }
 0x822   :  { %v2733_v28 = vpack.c.bf16 %v4208_v61, %v4212_v20 }
 0x823   :  { %3942 = vmatprep.mubr.bf16.mxu1 %v2732_v24 }
 0x824   :  { %3943 = vmatmul.mubr.bf16.vlgmr.msra.gmra.mxu1 %v2733_v28  ;;  %v4214_v4 = vpop.eup %4213 }
 0x826   :  { %v4216_v49 = vpop.eup %4215 }
 0x828   :  { %v4218_v38 = vpop.eup %4217 }
 0x829   :  { %v4220_v23 = vpop.eup %4219  ;;  %v2734_v51 = vpack.c.bf16 %v4218_v38, %v4214_v4 }
 0x82a   :  { %v2735_v35 = vpack.c.bf16 %v4216_v49, %v4220_v23 }
 0x82b   :  { %3946 = vmatprep.mubr.bf16.mxu1 %v2734_v51 }
 0x82c   :  { %3947 = vmatmul.mubr.bf16.gmra.mxu1 %v2735_v35 }
 0x8e4   :  { %v3944_v50 = vpop.f32.mrf.mxu1 }
 0x8e5   :  { %v2850_v48 = vadd.f32 %v3944_v50, %v3041_v6 }
 0x8e6   :  { %v2841_v43 = vpop.f32.mrf.mxu1 }
 0x8e7   :  { %2874 = vst [vmem:[#allocation3 + $0x10] sm:$0xff] %v2850_v48  ;;  %v2842_v27 = vadd.f32 %v3041_v6, %v2841_v43 }
 0x8e8   :  { %v3945_v12 = vpop.f32.mrf.mxu1 }
 0x8e9   :  { %2872 = vst [vmem:[#allocation3] sm:$0xff] %v2842_v27  ;;  %v2853_v54 = vadd.f32 %v3945_v12, %v3041_v6 }
 0x8ea   :  { %v2844_v1 = vpop.f32.mrf.mxu1 }
 0x8eb   :  { %2875 = vst [vmem:[#allocation3 + $0x18] sm:$0xff] %v2853_v54  ;;  %v2845_v44 = vadd.f32 %v3041_v6, %v2844_v1 }
 0x8ec   :  { %v3948_v55 = vpop.f32.mrf.mxu1 }
 0x8ed   :  { %2873 = vst [vmem:[#allocation3 + $0x8] sm:$0xff] %v2845_v44  ;;  %v2866_v41 = vadd.f32 %v3948_v55, %v3041_v6 }
 0x8ee   :  { %v2857_v39 = vpop.f32.mrf.mxu1 }
 0x8ef   :  { %2878 = vst [vmem:[#allocation3 + $0x30] sm:$0xff] %v2866_v41  ;;  %v2858_v53 = vadd.f32 %v3041_v6, %v2857_v39 }
 0x8f0   :  { %v3949_v52 = vpop.f32.mrf.mxu1 }
 0x8f1   :  { %2876 = vst [vmem:[#allocation3 + $0x20] sm:$0xff] %v2858_v53  ;;  %v2869_v11 = vadd.f32 %v3949_v52, %v3041_v6 }
 0x8f2   :  { %v2860_v40 = vpop.f32.mrf.mxu1 }
 0x8f3   :  { %2879 = vst [vmem:[#allocation3 + $0x38] sm:$0xff] %v2869_v11  ;;  %v2861_v18 = vadd.f32 %v3041_v6, %v2860_v40 }
 0x8f5   :  { %2877 = vst [vmem:[#allocation3 + $0x28] sm:$0xff] %v2861_v18 }
 0x8f6   :  { %4270 = shalt.err (!%p4267_p4)
}
 0x8f7   :  { %s4284_s1 = smov 128   ;;  %s4285_s17 = smov 8  }
 0x8f8   :  { %2891 = dma.vmem_to_hbm [thread:$0]  %s2886_s16, 1024, %s5471_s8, [#allocation4], %s4284_s1, %s4284_s1, %s4285_s17  }
 0x8f9   :  { %4279 = dma.done.wait [#allocation4], 1024  }
 0x8fa   :  { %4280 = vsyncadd [#allocation4], 4294966272 }
 0x8fb   :  { %2895 = vsyncpa [#allocation4], 1 }

</bundles_post_ra>
